<compile_context>
chip_gen: v7x
topology: tpu7x:2x2x1
jax: 0.10.0
libtpu: 0.0.40
codegen_flags: <defaults>
</compile_context>

<pallas_src>
import functools
import math

import numpy as np

import jax
import jax.numpy as jnp
from jax.experimental import pallas as pl
from jax.experimental.pallas import tpu as pltpu

# ---- "args" stand-ins (deterministic constants) ----------------------------
LAMDA_MSE = 1.0
LAMDA_SSIM = 1.0
LAMDA_TV = 0.1

# ---- SSIM constants ---------------------------------------------------------
WIN = 11
HALF = WIN // 2
SIGMA = 1.5
C1 = 0.01 ** 2
C2 = 0.03 ** 2


# ---- Gaussian blur helpers (built with NumPy so kernel taps are immediates) --
def _gaussian_1d(win: int, sigma: float) -> np.ndarray:
    xs = np.arange(win, dtype=np.float64)
    g = np.exp(-((xs - win // 2) ** 2) / (2.0 * sigma ** 2))
    return (g / g.sum()).astype(np.float32)


def _conv_matrix(n: int, g: np.ndarray) -> np.ndarray:
    """A[i, m] = g[m - i + win//2] (zero outside the band) so that
    (A @ x) == conv1d(x, g) with zero padding, 'same' size."""
    win = g.shape[0]
    half = win // 2
    i = np.arange(n)[:, None]
    m = np.arange(n)[None, :]
    k = m - i + half
    valid = (k >= 0) & (k < win)
    return np.where(valid, g[np.clip(k, 0, win - 1)], 0.0).astype(np.float32)


def _vmem_capacity_bytes() -> int:
    try:
        return int(pltpu.get_tpu_info().vmem_capacity_bytes)
    except Exception:
        return 128 * 1024 * 1024  # v5e/v6e default


# ---- Pallas kernel -----------------------------------------------------------
def _sum11(a):
    # (R, C) -> (1, 1): lane reduce then sublane reduce (finalize only).
    return jnp.sum(jnp.sum(a, axis=1, keepdims=True), axis=0, keepdims=True)


def _content_loss_kernel(x_ref, y_ref, ah_ref, out_ref, acc_ref, *,
                         W, gauss, k_mse, k_ssim, k_dh, k_dw):
    H, TBW = x_ref.shape
    i = pl.program_id(1)

    @pl.when(i == 0)
    def _init():
        acc_ref[...] = jnp.zeros_like(acc_ref)

    x = x_ref[...]            # (H, TBW) f32, TB planes lane-stacked
    y = y_ref[...]            # (H, TBW) f32
    ah = ah_ref[...]          # (H, H) bf16 Toeplitz (H-blur, zero padded)

    # Hoisted plane-boundary masks (lane-stacked planes of width W).
    col = jax.lax.broadcasted_iota(jnp.int32, (H, TBW), 1)
    row = jax.lax.broadcasted_iota(jnp.int32, (H, TBW), 0)
    wcol = col % W
    m_pos = [wcol < (W - d) for d in range(1, HALF + 1)]   # column c+d in plane
    m_neg = [wcol >= d for d in range(1, HALF + 1)]        # column c-d in plane

    def shift_l(v, d):
        # out[., c] = v[., c + d]  (lane rotate on the XLU; wrap is masked out)
        return pltpu.roll(v, shift=(-d) % TBW, axis=1)

    def wblur(v):
        # 11-tap zero-padded Gaussian along W, f32, per lane-stacked plane.
        out = gauss[HALF] * v
        for d in range(1, HALF + 1):
            right = jnp.where(m_pos[d - 1], shift_l(v, d), 0.0)
            left = jnp.where(m_neg[d - 1], shift_l(v, -d), 0.0)
            out = out + gauss[HALF + d] * (right + left)   # symmetric taps
        return out

    def blur(q):
        # Separable blur: H-blur on the MXU (bf16 operands, f32 accumulate),
        # then W-blur on VPU/XLU in f32 (no second bf16 rounding).
        hb = jnp.dot(ah, q.astype(jnp.bfloat16),
                     preferred_element_type=jnp.float32)
        return wblur(hb)

    # Products are computed in f32; only the MXU operands are bf16.
    mu1 = blur(x)
    mu2 = blur(y)
    exx = blur(x * x)
    eyy = blur(y * y)
    exy = blur(x * y)

    mu1_sq = mu1 * mu1
    mu2_sq = mu2 * mu2
    mu12 = mu1 * mu2
    sigma1_sq = exx - mu1_sq
    sigma2_sq = eyy - mu2_sq
    sigma12 = exy - mu12

    num = (2.0 * mu12 + C1) * (2.0 * sigma12 + C2)
    den = (mu1_sq + mu2_sq + C1) * (sigma1_sq + sigma2_sq + C2)
    ssim_map = num * pl.reciprocal(den, approx=True)        # EUP, not VALU

    # ---- MSE + TV of the difference image (full-shape, masked at borders) ----
    diff = x - y
    dw = jnp.where(m_pos[0], shift_l(diff, 1) - diff, 0.0)              # (H, TBW)
    dh = jnp.where(row < (H - 1),
                   pltpu.roll(diff, shift=H - 1, axis=0) - diff, 0.0)   # (H, TBW)

    # Single fused, pre-scaled accumulator (normalizers folded at trace time).
    acc_ref[...] += (k_mse * (diff * diff) - k_ssim * ssim_map
                     + k_dh * (dh * dh) + k_dw * (dw * dw))

    @pl.when(i == pl.num_programs(1) - 1)
    def _finalize():
        out_ref[0] = _sum11(acc_ref[...])


# ---- wrapper ----------------------------------------------------------------
def _choose_tb(B: int, W: int, max_lanes: int) -> int:
    """Planes per grid step.  TB*W is kept a multiple of 128 (lane-dense) and
    TB is grown only while the block count stays even, so the leading
    "parallel" grid axis can split across v7x's two TensorCores."""
    base = 128 // math.gcd(W, 128)     # smallest lane-aligned TB
    if B % base != 0:
        # TODO(synk): ragged B*W; fall back to a single full-width block.
        return B
    tb = base
    while (B % (tb * 2) == 0 and (tb * 2) * W <= max_lanes
           and (B // (tb * 2)) % 2 == 0):
        tb *= 2
    return tb


@functools.partial(jax.jit, static_argnames=("max_lanes",))
def content_loss(inp, fused, max_lanes=None):
    # layout: NCHW
    N, C, H, W = inp.shape
    B = N * C

    # VMEM-derived limits: ~40 MiB on v7x (64 MiB/TC), 64 MiB on v5e/v6e.
    vmem_cap = _vmem_capacity_bytes()
    vmem_limit = min(vmem_cap * 5 // 8, 64 * 1024 * 1024)
    if max_lanes is None:
        # Per-step working set ~ (2 inputs x 2 pipeline buffers + accumulator +
        # ~30 f32/bf16 temporaries) * H * TBW * 4B; keep it under half the limit.
        lanes = (vmem_limit // 2) // (160 * H)
        max_lanes = int(min(1024, max(128, (lanes // 128) * 128)))

    TB = _choose_tb(B, W, max_lanes)
    TBW = TB * W
    blocks = B // TB
    # Leading "parallel" axis: lets v7x's 2 TensorCores split the batch, each
    # with its own output block + scratch accumulator (no races).
    n_par = 2 if (blocks % 2 == 0 and blocks >= 2) else 1
    inner = blocks // n_par

    # Lane-stacked layout (H, B*W): plane b occupies columns [b*W, (b+1)*W).
    xs = inp.reshape(B, H, W).astype(jnp.float32).transpose(1, 0, 2).reshape(H, B * W)
    ys = fused.reshape(B, H, W).astype(jnp.float32).transpose(1, 0, 2).reshape(H, B * W)

    g = _gaussian_1d(WIN, SIGMA)
    ah = jnp.asarray(_conv_matrix(H, g), dtype=jnp.bfloat16)   # (H, H) H-blur

    n_full = B * H * W
    kernel = functools.partial(
        _content_loss_kernel,
        W=W,
        gauss=tuple(float(v) for v in g),
        k_mse=LAMDA_MSE / n_full,
        k_ssim=LAMDA_SSIM / n_full,
        k_dh=LAMDA_TV / (B * (H - 1) * W),
        k_dw=LAMDA_TV / (B * H * (W - 1)),
    )

    sums = pl.pallas_call(
        kernel,
        out_shape=jax.ShapeDtypeStruct((n_par, 1, 1), jnp.float32),
        grid=(n_par, inner),
        in_specs=[
            pl.BlockSpec((H, TBW), lambda c, i: (0, c * inner + i)),
            pl.BlockSpec((H, TBW), lambda c, i: (0, c * inner + i)),
            pl.BlockSpec((H, H), lambda c, i: (0, 0)),   # constant block, no re-DMA
        ],
        out_specs=pl.BlockSpec((1, 1, 1), lambda c, i: (c, 0, 0)),
        scratch_shapes=[
            pltpu.VMEM((H, TBW), jnp.float32),           # fused pre-scaled accumulator
        ],
        compiler_params=pltpu.CompilerParams(
            dimension_semantics=("parallel", "arbitrary"),
            vmem_limit_bytes=int(vmem_limit)),
    )(xs, ys, ah)

    # loss = lamda_mse*mse + lamda_ssim*(1 - mean(ssim)) + lamda_tv*tv
    #      = lamda_ssim + sum(per-element pre-scaled contributions)
    return LAMDA_SSIM + jnp.sum(sums)


# ---- pure-JAX reference (same math, no Pallas) -------------------------------
def content_loss_ref(inp, fused):
    N, C, H, W = inp.shape
    B = N * C
    x = inp.reshape(B, H, W).astype(jnp.float32)
    y = fused.reshape(B, H, W).astype(jnp.float32)
    g = _gaussian_1d(WIN, SIGMA)
    ah = jnp.asarray(_conv_matrix(H, g))
    aw = jnp.asarray(_conv_matrix(W, g))

    def blur(z):
        return jnp.einsum("hH,bHW,wW->bhw", ah, z, aw)

    mu1, mu2 = blur(x), blur(y)
    s1 = blur(x * x) - mu1 * mu1
    s2 = blur(y * y) - mu2 * mu2
    s12 = blur(x * y) - mu1 * mu2
    ssim_map = ((2 * mu1 * mu2 + C1) * (2 * s12 + C2)) / (
        (mu1 * mu1 + mu2 * mu2 + C1) * (s1 + s2 + C2))
    mse = jnp.mean((x - y) ** 2)
    diff = x - y
    tv = jnp.mean((diff[:, 1:, :] - diff[:, :-1, :]) ** 2) + \
         jnp.mean((diff[:, :, 1:] - diff[:, :, :-1]) ** 2)
    return LAMDA_MSE * mse + LAMDA_SSIM * (1.0 - jnp.mean(ssim_map)) + LAMDA_TV * tv


if __name__ == "__main__":
    key = jax.random.PRNGKey(0)

    cases = [
        ((2, 4, 16, 16), None),   # single lane-dense block, n_par=1
        ((2, 4, 32, 32), None),   # 2 blocks -> leading-axis parallel split
        ((4, 8, 16, 16), 128),    # small forced tile: parallel split + multi-step accumulation
    ]
    for shape, max_lanes in cases:
        key, k1, k2 = jax.random.split(key, 3)
        inp = jax.random.uniform(k1, shape, dtype=jnp.float32)
        fused = jax.random.uniform(k2, shape, dtype=jnp.float32)

        loss = jax.block_until_ready(content_loss(inp, fused, max_lanes=max_lanes))
        ref = content_loss_ref(inp, fused)
        # Single bf16 matmul stage (H-blur) + approx reciprocal vs f32 einsum
        # reference => compare with bf16-level tolerance.
        assert jnp.allclose(loss, ref, rtol=1e-2, atol=1e-3), (shape, loss, ref)

    print("KERNEL_OK")
</pallas_src>

<mosaic_0001>
module attributes {stable_mosaic.version = 11 : i64} {
  func.func @_content_loss_kernel(%arg0: i32, %arg1: i32, %arg2: memref<16x128xf32, #tpu.memory_space<vmem>>, %arg3: memref<16x128xf32, #tpu.memory_space<vmem>>, %arg4: memref<16x16xbf16, #tpu.memory_space<vmem>>, %arg5: memref<1x1x1xf32, #tpu.memory_space<vmem>>, %arg6: memref<16x128xf32, #tpu.memory_space<vmem>>) attributes {dimension_semantics = [#tpu.dimension_semantics<parallel>, #tpu.dimension_semantics<arbitrary>], iteration_bounds = array<i64: 1, 1>, scalar_prefetch = 0 : i64, scratch_operands = 1 : i64, tpu.core_type = #tpu.core_type<tc>, window_params = [{transform_indices = @transform_0, window_bounds = array<i64: 16, 128>}, {transform_indices = @transform_1, window_bounds = array<i64: 16, 128>}, {pipeline_mode = #tpu.pipeline_mode<synchronous>, transform_indices = @transform_2, window_bounds = array<i64: 16, 16>}, {transform_indices = @transform_3, window_bounds = array<i64: 1, 1, 1>}]} {
    %c0_i32 = arith.constant 0 : i32
    %0 = arith.cmpi eq, %arg1, %c0_i32 : i32
    %1 = arith.extui %0 : i1 to i32
    %c0_i32_0 = arith.constant 0 : i32
    %2 = arith.cmpi ne, %1, %c0_i32_0 : i32
    scf.if %2 {
      %cst_161 = arith.constant 0.000000e+00 : f32
      %372 = vector.broadcast %cst_161 : f32 to vector<16x128xf32>
      %c0_162 = arith.constant 0 : index
      %c0_163 = arith.constant 0 : index
      %373 = vector.load %arg6[%c0_162, %c0_163] : memref<16x128xf32, #tpu.memory_space<vmem>>, vector<16x128xf32>
      tpu.vector_store %arg6[%c0_162, %c0_163], %372 {strides = array<i32>} : memref<16x128xf32, #tpu.memory_space<vmem>>, vector<16x128xf32>,
    } else {
    }
    %c0 = arith.constant 0 : index
    %c0_1 = arith.constant 0 : index
    %3 = vector.load %arg2[%c0, %c0_1] : memref<16x128xf32, #tpu.memory_space<vmem>>, vector<16x128xf32>
    %c0_2 = arith.constant 0 : index
    %c0_3 = arith.constant 0 : index
    %4 = vector.load %arg3[%c0_2, %c0_3] : memref<16x128xf32, #tpu.memory_space<vmem>>, vector<16x128xf32>
    %c0_4 = arith.constant 0 : index
    %c0_5 = arith.constant 0 : index
    %5 = vector.load %arg4[%c0_4, %c0_5] : memref<16x16xbf16, #tpu.memory_space<vmem>>, vector<16x16xbf16>
    %6 = tpu.iota {dimensions = array<i32: 1>} : vector<16x128xi32>
    %7 = tpu.iota {dimensions = array<i32: 0>} : vector<16x128xi32>
    %c16_i32 = arith.constant 16 : i32
    %c0_i32_6 = arith.constant 0 : i32
    %8 = arith.cmpi eq, %c16_i32, %c0_i32_6 : i32
    %c1_i32 = arith.constant 1 : i32
    %9 = arith.select %8, %c1_i32, %c16_i32 : i32
    %10 = vector.broadcast %9 : i32 to vector<16x128xi32>
    %11 = arith.remsi %6, %10 : vector<16x128xi32>
    %c0_i32_7 = arith.constant 0 : i32
    %12 = vector.broadcast %c0_i32_7 : i32 to vector<16x128xi32>
    %13 = arith.cmpi ne, %11, %12 : vector<16x128xi32>
    %c0_i32_8 = arith.constant 0 : i32
    %14 = vector.broadcast %c0_i32_8 : i32 to vector<16x128xi32>
    %15 = arith.cmpi slt, %11, %14 : vector<16x128xi32>
    %c0_i32_9 = arith.constant 0 : i32
    %16 = arith.cmpi slt, %9, %c0_i32_9 : i32
    %17 = vector.broadcast %16 : i1 to vector<16x128xi1>
    %18 = vector.broadcast %17 : vector<16x128xi1> to vector<16x128xi1>
    %19 = arith.xori %15, %18 : vector<16x128xi1>
    %20 = arith.andi %19, %13 : vector<16x128xi1>
    %21 = vector.broadcast %9 : i32 to vector<16x128xi32>
    %22 = arith.addi %11, %21 : vector<16x128xi32>
    %23 = arith.select %20, %22, %11 : vector<16x128xi1>, vector<16x128xi32>
    %c15_i32 = arith.constant 15 : i32
    %24 = vector.broadcast %c15_i32 : i32 to vector<16x128xi32>
    %25 = arith.cmpi slt, %23, %24 : vector<16x128xi32>
    %c14_i32 = arith.constant 14 : i32
    %26 = vector.broadcast %c14_i32 : i32 to vector<16x128xi32>
    %27 = arith.cmpi slt, %23, %26 : vector<16x128xi32>
    %c13_i32 = arith.constant 13 : i32
    %28 = vector.broadcast %c13_i32 : i32 to vector<16x128xi32>
    %29 = arith.cmpi slt, %23, %28 : vector<16x128xi32>
    %c12_i32 = arith.constant 12 : i32
    %30 = vector.broadcast %c12_i32 : i32 to vector<16x128xi32>
    %31 = arith.cmpi slt, %23, %30 : vector<16x128xi32>
    %c11_i32 = arith.constant 11 : i32
    %32 = vector.broadcast %c11_i32 : i32 to vector<16x128xi32>
    %33 = arith.cmpi slt, %23, %32 : vector<16x128xi32>
    %c1_i32_10 = arith.constant 1 : i32
    %34 = vector.broadcast %c1_i32_10 : i32 to vector<16x128xi32>
    %35 = arith.cmpi sge, %23, %34 : vector<16x128xi32>
    %c2_i32 = arith.constant 2 : i32
    %36 = vector.broadcast %c2_i32 : i32 to vector<16x128xi32>
    %37 = arith.cmpi sge, %23, %36 : vector<16x128xi32>
    %c3_i32 = arith.constant 3 : i32
    %38 = vector.broadcast %c3_i32 : i32 to vector<16x128xi32>
    %39 = arith.cmpi sge, %23, %38 : vector<16x128xi32>
    %c4_i32 = arith.constant 4 : i32
    %40 = vector.broadcast %c4_i32 : i32 to vector<16x128xi32>
    %41 = arith.cmpi sge, %23, %40 : vector<16x128xi32>
    %c5_i32 = arith.constant 5 : i32
    %42 = vector.broadcast %c5_i32 : i32 to vector<16x128xi32>
    %43 = arith.cmpi sge, %23, %42 : vector<16x128xi32>
    %44 = arith.truncf %3 : vector<16x128xf32> to vector<16x128xbf16>
    %cst = arith.constant dense<0.000000e+00> : vector<16x128xf32>
    %45 = tpu.matmul %5, %44, %cst {dimension_numbers = #tpu.dot_dimension_numbers<[1], [0], [0], [1], [0, 0, 1, 1], [], []>} : vector<16x16xbf16>, vector<16x128xbf16>, vector<16x128xf32> -> vector<16x128xf32>
    %cst_11 = arith.constant 0.266011715 : f32
    %46 = vector.broadcast %cst_11 : f32 to vector<16x128xf32>
    %47 = arith.mulf %46, %45 : vector<16x128xf32>
    %c127_i32 = arith.constant 127 : i32
    %48 = tpu.dynamic_rotate %45 by %c127_i32 dim 1 : vector<16x128xf32>, i32 -> vector<16x128xf32>
    %cst_12 = arith.constant 0.000000e+00 : f32
    %49 = vector.broadcast %cst_12 : f32 to vector<16x128xf32>
    %50 = arith.select %25, %48, %49 : vector<16x128xi1>, vector<16x128xf32>
    %c1_i32_13 = arith.constant 1 : i32
    %51 = tpu.dynamic_rotate %45 by %c1_i32_13 dim 1 : vector<16x128xf32>, i32 -> vector<16x128xf32>
    %cst_14 = arith.constant 0.000000e+00 : f32
    %52 = vector.broadcast %cst_14 : f32 to vector<16x128xf32>
    %53 = arith.select %35, %51, %52 : vector<16x128xi1>, vector<16x128xf32>
    %54 = arith.addf %50, %53 : vector<16x128xf32>
    %cst_15 = arith.constant 0.213005543 : f32
    %55 = vector.broadcast %cst_15 : f32 to vector<16x128xf32>
    %56 = arith.mulf %55, %54 : vector<16x128xf32>
    %57 = arith.addf %47, %56 : vector<16x128xf32>
    %c126_i32 = arith.constant 126 : i32
    %58 = tpu.dynamic_rotate %45 by %c126_i32 dim 1 : vector<16x128xf32>, i32 -> vector<16x128xf32>
    %cst_16 = arith.constant 0.000000e+00 : f32
    %59 = vector.broadcast %cst_16 : f32 to vector<16x128xf32>
    %60 = arith.select %27, %58, %59 : vector<16x128xi1>, vector<16x128xf32>
    %c2_i32_17 = arith.constant 2 : i32
    %61 = tpu.dynamic_rotate %45 by %c2_i32_17 dim 1 : vector<16x128xf32>, i32 -> vector<16x128xf32>
    %cst_18 = arith.constant 0.000000e+00 : f32
    %62 = vector.broadcast %cst_18 : f32 to vector<16x128xf32>
    %63 = arith.select %37, %61, %62 : vector<16x128xi1>, vector<16x128xf32>
    %64 = arith.addf %60, %63 : vector<16x128xf32>
    %cst_19 = arith.constant 0.109360687 : f32
    %65 = vector.broadcast %cst_19 : f32 to vector<16x128xf32>
    %66 = arith.mulf %65, %64 : vector<16x128xf32>
    %67 = arith.addf %57, %66 : vector<16x128xf32>
    %c125_i32 = arith.constant 125 : i32
    %68 = tpu.dynamic_rotate %45 by %c125_i32 dim 1 : vector<16x128xf32>, i32 -> vector<16x128xf32>
    %cst_20 = arith.constant 0.000000e+00 : f32
    %69 = vector.broadcast %cst_20 : f32 to vector<16x128xf32>
    %70 = arith.select %29, %68, %69 : vector<16x128xi1>, vector<16x128xf32>
    %c3_i32_21 = arith.constant 3 : i32
    %71 = tpu.dynamic_rotate %45 by %c3_i32_21 dim 1 : vector<16x128xf32>, i32 -> vector<16x128xf32>
    %cst_22 = arith.constant 0.000000e+00 : f32
    %72 = vector.broadcast %cst_22 : f32 to vector<16x128xf32>
    %73 = arith.select %39, %71, %72 : vector<16x128xi1>, vector<16x128xf32>
    %74 = arith.addf %70, %73 : vector<16x128xf32>
    %cst_23 = arith.constant 0.0360007733 : f32
    %75 = vector.broadcast %cst_23 : f32 to vector<16x128xf32>
    %76 = arith.mulf %75, %74 : vector<16x128xf32>
    %77 = arith.addf %67, %76 : vector<16x128xf32>
    %c124_i32 = arith.constant 124 : i32
    %78 = tpu.dynamic_rotate %45 by %c124_i32 dim 1 : vector<16x128xf32>, i32 -> vector<16x128xf32>
    %cst_24 = arith.constant 0.000000e+00 : f32
    %79 = vector.broadcast %cst_24 : f32 to vector<16x128xf32>
    %80 = arith.select %31, %78, %79 : vector<16x128xi1>, vector<16x128xf32>
    %c4_i32_25 = arith.constant 4 : i32
    %81 = tpu.dynamic_rotate %45 by %c4_i32_25 dim 1 : vector<16x128xf32>, i32 -> vector<16x128xf32>
    %cst_26 = arith.constant 0.000000e+00 : f32
    %82 = vector.broadcast %cst_26 : f32 to vector<16x128xf32>
    %83 = arith.select %41, %81, %82 : vector<16x128xi1>, vector<16x128xf32>
    %84 = arith.addf %80, %83 : vector<16x128xf32>
    %cst_27 = arith.constant 0.00759875821 : f32
    %85 = vector.broadcast %cst_27 : f32 to vector<16x128xf32>
    %86 = arith.mulf %85, %84 : vector<16x128xf32>
    %87 = arith.addf %77, %86 : vector<16x128xf32>
    %c123_i32 = arith.constant 123 : i32
    %88 = tpu.dynamic_rotate %45 by %c123_i32 dim 1 : vector<16x128xf32>, i32 -> vector<16x128xf32>
    %cst_28 = arith.constant 0.000000e+00 : f32
    %89 = vector.broadcast %cst_28 : f32 to vector<16x128xf32>
    %90 = arith.select %33, %88, %89 : vector<16x128xi1>, vector<16x128xf32>
    %c5_i32_29 = arith.constant 5 : i32
    %91 = tpu.dynamic_rotate %45 by %c5_i32_29 dim 1 : vector<16x128xf32>, i32 -> vector<16x128xf32>
    %cst_30 = arith.constant 0.000000e+00 : f32
    %92 = vector.broadcast %cst_30 : f32 to vector<16x128xf32>
    %93 = arith.select %43, %91, %92 : vector<16x128xi1>, vector<16x128xf32>
    %94 = arith.addf %90, %93 : vector<16x128xf32>
    %cst_31 = arith.constant 0.00102838012 : f32
    %95 = vector.broadcast %cst_31 : f32 to vector<16x128xf32>
    %96 = arith.mulf %95, %94 : vector<16x128xf32>
    %97 = arith.addf %87, %96 : vector<16x128xf32>
    %98 = arith.truncf %4 : vector<16x128xf32> to vector<16x128xbf16>
    %cst_32 = arith.constant dense<0.000000e+00> : vector<16x128xf32>
    %99 = tpu.matmul %5, %98, %cst_32 {dimension_numbers = #tpu.dot_dimension_numbers<[1], [0], [0], [1], [0, 0, 1, 1], [], []>} : vector<16x16xbf16>, vector<16x128xbf16>, vector<16x128xf32> -> vector<16x128xf32>
    %cst_33 = arith.constant 0.266011715 : f32
    %100 = vector.broadcast %cst_33 : f32 to vector<16x128xf32>
    %101 = arith.mulf %100, %99 : vector<16x128xf32>
    %c127_i32_34 = arith.constant 127 : i32
    %102 = tpu.dynamic_rotate %99 by %c127_i32_34 dim 1 : vector<16x128xf32>, i32 -> vector<16x128xf32>
    %cst_35 = arith.constant 0.000000e+00 : f32
    %103 = vector.broadcast %cst_35 : f32 to vector<16x128xf32>
    %104 = arith.select %25, %102, %103 : vector<16x128xi1>, vector<16x128xf32>
    %c1_i32_36 = arith.constant 1 : i32
    %105 = tpu.dynamic_rotate %99 by %c1_i32_36 dim 1 : vector<16x128xf32>, i32 -> vector<16x128xf32>
    %cst_37 = arith.constant 0.000000e+00 : f32
    %106 = vector.broadcast %cst_37 : f32 to vector<16x128xf32>
    %107 = arith.select %35, %105, %106 : vector<16x128xi1>, vector<16x128xf32>
    %108 = arith.addf %104, %107 : vector<16x128xf32>
    %cst_38 = arith.constant 0.213005543 : f32
    %109 = vector.broadcast %cst_38 : f32 to vector<16x128xf32>
    %110 = arith.mulf %109, %108 : vector<16x128xf32>
    %111 = arith.addf %101, %110 : vector<16x128xf32>
    %c126_i32_39 = arith.constant 126 : i32
    %112 = tpu.dynamic_rotate %99 by %c126_i32_39 dim 1 : vector<16x128xf32>, i32 -> vector<16x128xf32>
    %cst_40 = arith.constant 0.000000e+00 : f32
    %113 = vector.broadcast %cst_40 : f32 to vector<16x128xf32>
    %114 = arith.select %27, %112, %113 : vector<16x128xi1>, vector<16x128xf32>
    %c2_i32_41 = arith.constant 2 : i32
    %115 = tpu.dynamic_rotate %99 by %c2_i32_41 dim 1 : vector<16x128xf32>, i32 -> vector<16x128xf32>
    %cst_42 = arith.constant 0.000000e+00 : f32
    %116 = vector.broadcast %cst_42 : f32 to vector<16x128xf32>
    %117 = arith.select %37, %115, %116 : vector<16x128xi1>, vector<16x128xf32>
    %118 = arith.addf %114, %117 : vector<16x128xf32>
    %cst_43 = arith.constant 0.109360687 : f32
    %119 = vector.broadcast %cst_43 : f32 to vector<16x128xf32>
    %120 = arith.mulf %119, %118 : vector<16x128xf32>
    %121 = arith.addf %111, %120 : vector<16x128xf32>
    %c125_i32_44 = arith.constant 125 : i32
    %122 = tpu.dynamic_rotate %99 by %c125_i32_44 dim 1 : vector<16x128xf32>, i32 -> vector<16x128xf32>
    %cst_45 = arith.constant 0.000000e+00 : f32
    %123 = vector.broadcast %cst_45 : f32 to vector<16x128xf32>
    %124 = arith.select %29, %122, %123 : vector<16x128xi1>, vector<16x128xf32>
    %c3_i32_46 = arith.constant 3 : i32
    %125 = tpu.dynamic_rotate %99 by %c3_i32_46 dim 1 : vector<16x128xf32>, i32 -> vector<16x128xf32>
    %cst_47 = arith.constant 0.000000e+00 : f32
    %126 = vector.broadcast %cst_47 : f32 to vector<16x128xf32>
    %127 = arith.select %39, %125, %126 : vector<16x128xi1>, vector<16x128xf32>
    %128 = arith.addf %124, %127 : vector<16x128xf32>
    %cst_48 = arith.constant 0.0360007733 : f32
    %129 = vector.broadcast %cst_48 : f32 to vector<16x128xf32>
    %130 = arith.mulf %129, %128 : vector<16x128xf32>
    %131 = arith.addf %121, %130 : vector<16x128xf32>
    %c124_i32_49 = arith.constant 124 : i32
    %132 = tpu.dynamic_rotate %99 by %c124_i32_49 dim 1 : vector<16x128xf32>, i32 -> vector<16x128xf32>
    %cst_50 = arith.constant 0.000000e+00 : f32
    %133 = vector.broadcast %cst_50 : f32 to vector<16x128xf32>
    %134 = arith.select %31, %132, %133 : vector<16x128xi1>, vector<16x128xf32>
    %c4_i32_51 = arith.constant 4 : i32
    %135 = tpu.dynamic_rotate %99 by %c4_i32_51 dim 1 : vector<16x128xf32>, i32 -> vector<16x128xf32>
    %cst_52 = arith.constant 0.000000e+00 : f32
    %136 = vector.broadcast %cst_52 : f32 to vector<16x128xf32>
    %137 = arith.select %41, %135, %136 : vector<16x128xi1>, vector<16x128xf32>
    %138 = arith.addf %134, %137 : vector<16x128xf32>
    %cst_53 = arith.constant 0.00759875821 : f32
    %139 = vector.broadcast %cst_53 : f32 to vector<16x128xf32>
    %140 = arith.mulf %139, %138 : vector<16x128xf32>
    %141 = arith.addf %131, %140 : vector<16x128xf32>
    %c123_i32_54 = arith.constant 123 : i32
    %142 = tpu.dynamic_rotate %99 by %c123_i32_54 dim 1 : vector<16x128xf32>, i32 -> vector<16x128xf32>
    %cst_55 = arith.constant 0.000000e+00 : f32
    %143 = vector.broadcast %cst_55 : f32 to vector<16x128xf32>
    %144 = arith.select %33, %142, %143 : vector<16x128xi1>, vector<16x128xf32>
    %c5_i32_56 = arith.constant 5 : i32
    %145 = tpu.dynamic_rotate %99 by %c5_i32_56 dim 1 : vector<16x128xf32>, i32 -> vector<16x128xf32>
    %cst_57 = arith.constant 0.000000e+00 : f32
    %146 = vector.broadcast %cst_57 : f32 to vector<16x128xf32>
    %147 = arith.select %43, %145, %146 : vector<16x128xi1>, vector<16x128xf32>
    %148 = arith.addf %144, %147 : vector<16x128xf32>
    %cst_58 = arith.constant 0.00102838012 : f32
    %149 = vector.broadcast %cst_58 : f32 to vector<16x128xf32>
    %150 = arith.mulf %149, %148 : vector<16x128xf32>
    %151 = arith.addf %141, %150 : vector<16x128xf32>
    %152 = arith.mulf %3, %3 : vector<16x128xf32>
    %153 = arith.truncf %152 : vector<16x128xf32> to vector<16x128xbf16>
    %cst_59 = arith.constant dense<0.000000e+00> : vector<16x128xf32>
    %154 = tpu.matmul %5, %153, %cst_59 {dimension_numbers = #tpu.dot_dimension_numbers<[1], [0], [0], [1], [0, 0, 1, 1], [], []>} : vector<16x16xbf16>, vector<16x128xbf16>, vector<16x128xf32> -> vector<16x128xf32>
    %cst_60 = arith.constant 0.266011715 : f32
    %155 = vector.broadcast %cst_60 : f32 to vector<16x128xf32>
    %156 = arith.mulf %155, %154 : vector<16x128xf32>
    %c127_i32_61 = arith.constant 127 : i32
    %157 = tpu.dynamic_rotate %154 by %c127_i32_61 dim 1 : vector<16x128xf32>, i32 -> vector<16x128xf32>
    %cst_62 = arith.constant 0.000000e+00 : f32
    %158 = vector.broadcast %cst_62 : f32 to vector<16x128xf32>
    %159 = arith.select %25, %157, %158 : vector<16x128xi1>, vector<16x128xf32>
    %c1_i32_63 = arith.constant 1 : i32
    %160 = tpu.dynamic_rotate %154 by %c1_i32_63 dim 1 : vector<16x128xf32>, i32 -> vector<16x128xf32>
    %cst_64 = arith.constant 0.000000e+00 : f32
    %161 = vector.broadcast %cst_64 : f32 to vector<16x128xf32>
    %162 = arith.select %35, %160, %161 : vector<16x128xi1>, vector<16x128xf32>
    %163 = arith.addf %159, %162 : vector<16x128xf32>
    %cst_65 = arith.constant 0.213005543 : f32
    %164 = vector.broadcast %cst_65 : f32 to vector<16x128xf32>
    %165 = arith.mulf %164, %163 : vector<16x128xf32>
    %166 = arith.addf %156, %165 : vector<16x128xf32>
    %c126_i32_66 = arith.constant 126 : i32
    %167 = tpu.dynamic_rotate %154 by %c126_i32_66 dim 1 : vector<16x128xf32>, i32 -> vector<16x128xf32>
    %cst_67 = arith.constant 0.000000e+00 : f32
    %168 = vector.broadcast %cst_67 : f32 to vector<16x128xf32>
    %169 = arith.select %27, %167, %168 : vector<16x128xi1>, vector<16x128xf32>
    %c2_i32_68 = arith.constant 2 : i32
    %170 = tpu.dynamic_rotate %154 by %c2_i32_68 dim 1 : vector<16x128xf32>, i32 -> vector<16x128xf32>
    %cst_69 = arith.constant 0.000000e+00 : f32
    %171 = vector.broadcast %cst_69 : f32 to vector<16x128xf32>
    %172 = arith.select %37, %170, %171 : vector<16x128xi1>, vector<16x128xf32>
    %173 = arith.addf %169, %172 : vector<16x128xf32>
    %cst_70 = arith.constant 0.109360687 : f32
    %174 = vector.broadcast %cst_70 : f32 to vector<16x128xf32>
    %175 = arith.mulf %174, %173 : vector<16x128xf32>
    %176 = arith.addf %166, %175 : vector<16x128xf32>
    %c125_i32_71 = arith.constant 125 : i32
    %177 = tpu.dynamic_rotate %154 by %c125_i32_71 dim 1 : vector<16x128xf32>, i32 -> vector<16x128xf32>
    %cst_72 = arith.constant 0.000000e+00 : f32
    %178 = vector.broadcast %cst_72 : f32 to vector<16x128xf32>
    %179 = arith.select %29, %177, %178 : vector<16x128xi1>, vector<16x128xf32>
    %c3_i32_73 = arith.constant 3 : i32
    %180 = tpu.dynamic_rotate %154 by %c3_i32_73 dim 1 : vector<16x128xf32>, i32 -> vector<16x128xf32>
    %cst_74 = arith.constant 0.000000e+00 : f32
    %181 = vector.broadcast %cst_74 : f32 to vector<16x128xf32>
    %182 = arith.select %39, %180, %181 : vector<16x128xi1>, vector<16x128xf32>
    %183 = arith.addf %179, %182 : vector<16x128xf32>
    %cst_75 = arith.constant 0.0360007733 : f32
    %184 = vector.broadcast %cst_75 : f32 to vector<16x128xf32>
    %185 = arith.mulf %184, %183 : vector<16x128xf32>
    %186 = arith.addf %176, %185 : vector<16x128xf32>
    %c124_i32_76 = arith.constant 124 : i32
    %187 = tpu.dynamic_rotate %154 by %c124_i32_76 dim 1 : vector<16x128xf32>, i32 -> vector<16x128xf32>
    %cst_77 = arith.constant 0.000000e+00 : f32
    %188 = vector.broadcast %cst_77 : f32 to vector<16x128xf32>
    %189 = arith.select %31, %187, %188 : vector<16x128xi1>, vector<16x128xf32>
    %c4_i32_78 = arith.constant 4 : i32
    %190 = tpu.dynamic_rotate %154 by %c4_i32_78 dim 1 : vector<16x128xf32>, i32 -> vector<16x128xf32>
    %cst_79 = arith.constant 0.000000e+00 : f32
    %191 = vector.broadcast %cst_79 : f32 to vector<16x128xf32>
    %192 = arith.select %41, %190, %191 : vector<16x128xi1>, vector<16x128xf32>
    %193 = arith.addf %189, %192 : vector<16x128xf32>
    %cst_80 = arith.constant 0.00759875821 : f32
    %194 = vector.broadcast %cst_80 : f32 to vector<16x128xf32>
    %195 = arith.mulf %194, %193 : vector<16x128xf32>
    %196 = arith.addf %186, %195 : vector<16x128xf32>
    %c123_i32_81 = arith.constant 123 : i32
    %197 = tpu.dynamic_rotate %154 by %c123_i32_81 dim 1 : vector<16x128xf32>, i32 -> vector<16x128xf32>
    %cst_82 = arith.constant 0.000000e+00 : f32
    %198 = vector.broadcast %cst_82 : f32 to vector<16x128xf32>
    %199 = arith.select %33, %197, %198 : vector<16x128xi1>, vector<16x128xf32>
    %c5_i32_83 = arith.constant 5 : i32
    %200 = tpu.dynamic_rotate %154 by %c5_i32_83 dim 1 : vector<16x128xf32>, i32 -> vector<16x128xf32>
    %cst_84 = arith.constant 0.000000e+00 : f32
    %201 = vector.broadcast %cst_84 : f32 to vector<16x128xf32>
    %202 = arith.select %43, %200, %201 : vector<16x128xi1>, vector<16x128xf32>
    %203 = arith.addf %199, %202 : vector<16x128xf32>
    %cst_85 = arith.constant 0.00102838012 : f32
    %204 = vector.broadcast %cst_85 : f32 to vector<16x128xf32>
    %205 = arith.mulf %204, %203 : vector<16x128xf32>
    %206 = arith.addf %196, %205 : vector<16x128xf32>
    %207 = arith.mulf %4, %4 : vector<16x128xf32>
    %208 = arith.truncf %207 : vector<16x128xf32> to vector<16x128xbf16>
    %cst_86 = arith.constant dense<0.000000e+00> : vector<16x128xf32>
    %209 = tpu.matmul %5, %208, %cst_86 {dimension_numbers = #tpu.dot_dimension_numbers<[1], [0], [0], [1], [0, 0, 1, 1], [], []>} : vector<16x16xbf16>, vector<16x128xbf16>, vector<16x128xf32> -> vector<16x128xf32>
    %cst_87 = arith.constant 0.266011715 : f32
    %210 = vector.broadcast %cst_87 : f32 to vector<16x128xf32>
    %211 = arith.mulf %210, %209 : vector<16x128xf32>
    %c127_i32_88 = arith.constant 127 : i32
    %212 = tpu.dynamic_rotate %209 by %c127_i32_88 dim 1 : vector<16x128xf32>, i32 -> vector<16x128xf32>
    %cst_89 = arith.constant 0.000000e+00 : f32
    %213 = vector.broadcast %cst_89 : f32 to vector<16x128xf32>
    %214 = arith.select %25, %212, %213 : vector<16x128xi1>, vector<16x128xf32>
    %c1_i32_90 = arith.constant 1 : i32
    %215 = tpu.dynamic_rotate %209 by %c1_i32_90 dim 1 : vector<16x128xf32>, i32 -> vector<16x128xf32>
    %cst_91 = arith.constant 0.000000e+00 : f32
    %216 = vector.broadcast %cst_91 : f32 to vector<16x128xf32>
    %217 = arith.select %35, %215, %216 : vector<16x128xi1>, vector<16x128xf32>
    %218 = arith.addf %214, %217 : vector<16x128xf32>
    %cst_92 = arith.constant 0.213005543 : f32
    %219 = vector.broadcast %cst_92 : f32 to vector<16x128xf32>
    %220 = arith.mulf %219, %218 : vector<16x128xf32>
    %221 = arith.addf %211, %220 : vector<16x128xf32>
    %c126_i32_93 = arith.constant 126 : i32
    %222 = tpu.dynamic_rotate %209 by %c126_i32_93 dim 1 : vector<16x128xf32>, i32 -> vector<16x128xf32>
    %cst_94 = arith.constant 0.000000e+00 : f32
    %223 = vector.broadcast %cst_94 : f32 to vector<16x128xf32>
    %224 = arith.select %27, %222, %223 : vector<16x128xi1>, vector<16x128xf32>
    %c2_i32_95 = arith.constant 2 : i32
    %225 = tpu.dynamic_rotate %209 by %c2_i32_95 dim 1 : vector<16x128xf32>, i32 -> vector<16x128xf32>
    %cst_96 = arith.constant 0.000000e+00 : f32
    %226 = vector.broadcast %cst_96 : f32 to vector<16x128xf32>
    %227 = arith.select %37, %225, %226 : vector<16x128xi1>, vector<16x128xf32>
    %228 = arith.addf %224, %227 : vector<16x128xf32>
    %cst_97 = arith.constant 0.109360687 : f32
    %229 = vector.broadcast %cst_97 : f32 to vector<16x128xf32>
    %230 = arith.mulf %229, %228 : vector<16x128xf32>
    %231 = arith.addf %221, %230 : vector<16x128xf32>
    %c125_i32_98 = arith.constant 125 : i32
    %232 = tpu.dynamic_rotate %209 by %c125_i32_98 dim 1 : vector<16x128xf32>, i32 -> vector<16x128xf32>
    %cst_99 = arith.constant 0.000000e+00 : f32
    %233 = vector.broadcast %cst_99 : f32 to vector<16x128xf32>
    %234 = arith.select %29, %232, %233 : vector<16x128xi1>, vector<16x128xf32>
    %c3_i32_100 = arith.constant 3 : i32
    %235 = tpu.dynamic_rotate %209 by %c3_i32_100 dim 1 : vector<16x128xf32>, i32 -> vector<16x128xf32>
    %cst_101 = arith.constant 0.000000e+00 : f32
    %236 = vector.broadcast %cst_101 : f32 to vector<16x128xf32>
    %237 = arith.select %39, %235, %236 : vector<16x128xi1>, vector<16x128xf32>
    %238 = arith.addf %234, %237 : vector<16x128xf32>
    %cst_102 = arith.constant 0.0360007733 : f32
    %239 = vector.broadcast %cst_102 : f32 to vector<16x128xf32>
    %240 = arith.mulf %239, %238 : vector<16x128xf32>
    %241 = arith.addf %231, %240 : vector<16x128xf32>
    %c124_i32_103 = arith.constant 124 : i32
    %242 = tpu.dynamic_rotate %209 by %c124_i32_103 dim 1 : vector<16x128xf32>, i32 -> vector<16x128xf32>
    %cst_104 = arith.constant 0.000000e+00 : f32
    %243 = vector.broadcast %cst_104 : f32 to vector<16x128xf32>
    %244 = arith.select %31, %242, %243 : vector<16x128xi1>, vector<16x128xf32>
    %c4_i32_105 = arith.constant 4 : i32
    %245 = tpu.dynamic_rotate %209 by %c4_i32_105 dim 1 : vector<16x128xf32>, i32 -> vector<16x128xf32>
    %cst_106 = arith.constant 0.000000e+00 : f32
    %246 = vector.broadcast %cst_106 : f32 to vector<16x128xf32>
    %247 = arith.select %41, %245, %246 : vector<16x128xi1>, vector<16x128xf32>
    %248 = arith.addf %244, %247 : vector<16x128xf32>
    %cst_107 = arith.constant 0.00759875821 : f32
    %249 = vector.broadcast %cst_107 : f32 to vector<16x128xf32>
    %250 = arith.mulf %249, %248 : vector<16x128xf32>
    %251 = arith.addf %241, %250 : vector<16x128xf32>
    %c123_i32_108 = arith.constant 123 : i32
    %252 = tpu.dynamic_rotate %209 by %c123_i32_108 dim 1 : vector<16x128xf32>, i32 -> vector<16x128xf32>
    %cst_109 = arith.constant 0.000000e+00 : f32
    %253 = vector.broadcast %cst_109 : f32 to vector<16x128xf32>
    %254 = arith.select %33, %252, %253 : vector<16x128xi1>, vector<16x128xf32>
    %c5_i32_110 = arith.constant 5 : i32
    %255 = tpu.dynamic_rotate %209 by %c5_i32_110 dim 1 : vector<16x128xf32>, i32 -> vector<16x128xf32>
    %cst_111 = arith.constant 0.000000e+00 : f32
    %256 = vector.broadcast %cst_111 : f32 to vector<16x128xf32>
    %257 = arith.select %43, %255, %256 : vector<16x128xi1>, vector<16x128xf32>
    %258 = arith.addf %254, %257 : vector<16x128xf32>
    %cst_112 = arith.constant 0.00102838012 : f32
    %259 = vector.broadcast %cst_112 : f32 to vector<16x128xf32>
    %260 = arith.mulf %259, %258 : vector<16x128xf32>
    %261 = arith.addf %251, %260 : vector<16x128xf32>
    %262 = arith.mulf %3, %4 : vector<16x128xf32>
    %263 = arith.truncf %262 : vector<16x128xf32> to vector<16x128xbf16>
    %cst_113 = arith.constant dense<0.000000e+00> : vector<16x128xf32>
    %264 = tpu.matmul %5, %263, %cst_113 {dimension_numbers = #tpu.dot_dimension_numbers<[1], [0], [0], [1], [0, 0, 1, 1], [], []>} : vector<16x16xbf16>, vector<16x128xbf16>, vector<16x128xf32> -> vector<16x128xf32>
    %cst_114 = arith.constant 0.266011715 : f32
    %265 = vector.broadcast %cst_114 : f32 to vector<16x128xf32>
    %266 = arith.mulf %265, %264 : vector<16x128xf32>
    %c127_i32_115 = arith.constant 127 : i32
    %267 = tpu.dynamic_rotate %264 by %c127_i32_115 dim 1 : vector<16x128xf32>, i32 -> vector<16x128xf32>
    %cst_116 = arith.constant 0.000000e+00 : f32
    %268 = vector.broadcast %cst_116 : f32 to vector<16x128xf32>
    %269 = arith.select %25, %267, %268 : vector<16x128xi1>, vector<16x128xf32>
    %c1_i32_117 = arith.constant 1 : i32
    %270 = tpu.dynamic_rotate %264 by %c1_i32_117 dim 1 : vector<16x128xf32>, i32 -> vector<16x128xf32>
    %cst_118 = arith.constant 0.000000e+00 : f32
    %271 = vector.broadcast %cst_118 : f32 to vector<16x128xf32>
    %272 = arith.select %35, %270, %271 : vector<16x128xi1>, vector<16x128xf32>
    %273 = arith.addf %269, %272 : vector<16x128xf32>
    %cst_119 = arith.constant 0.213005543 : f32
    %274 = vector.broadcast %cst_119 : f32 to vector<16x128xf32>
    %275 = arith.mulf %274, %273 : vector<16x128xf32>
    %276 = arith.addf %266, %275 : vector<16x128xf32>
    %c126_i32_120 = arith.constant 126 : i32
    %277 = tpu.dynamic_rotate %264 by %c126_i32_120 dim 1 : vector<16x128xf32>, i32 -> vector<16x128xf32>
    %cst_121 = arith.constant 0.000000e+00 : f32
    %278 = vector.broadcast %cst_121 : f32 to vector<16x128xf32>
    %279 = arith.select %27, %277, %278 : vector<16x128xi1>, vector<16x128xf32>
    %c2_i32_122 = arith.constant 2 : i32
    %280 = tpu.dynamic_rotate %264 by %c2_i32_122 dim 1 : vector<16x128xf32>, i32 -> vector<16x128xf32>
    %cst_123 = arith.constant 0.000000e+00 : f32
    %281 = vector.broadcast %cst_123 : f32 to vector<16x128xf32>
    %282 = arith.select %37, %280, %281 : vector<16x128xi1>, vector<16x128xf32>
    %283 = arith.addf %279, %282 : vector<16x128xf32>
    %cst_124 = arith.constant 0.109360687 : f32
    %284 = vector.broadcast %cst_124 : f32 to vector<16x128xf32>
    %285 = arith.mulf %284, %283 : vector<16x128xf32>
    %286 = arith.addf %276, %285 : vector<16x128xf32>
    %c125_i32_125 = arith.constant 125 : i32
    %287 = tpu.dynamic_rotate %264 by %c125_i32_125 dim 1 : vector<16x128xf32>, i32 -> vector<16x128xf32>
    %cst_126 = arith.constant 0.000000e+00 : f32
    %288 = vector.broadcast %cst_126 : f32 to vector<16x128xf32>
    %289 = arith.select %29, %287, %288 : vector<16x128xi1>, vector<16x128xf32>
    %c3_i32_127 = arith.constant 3 : i32
    %290 = tpu.dynamic_rotate %264 by %c3_i32_127 dim 1 : vector<16x128xf32>, i32 -> vector<16x128xf32>
    %cst_128 = arith.constant 0.000000e+00 : f32
    %291 = vector.broadcast %cst_128 : f32 to vector<16x128xf32>
    %292 = arith.select %39, %290, %291 : vector<16x128xi1>, vector<16x128xf32>
    %293 = arith.addf %289, %292 : vector<16x128xf32>
    %cst_129 = arith.constant 0.0360007733 : f32
    %294 = vector.broadcast %cst_129 : f32 to vector<16x128xf32>
    %295 = arith.mulf %294, %293 : vector<16x128xf32>
    %296 = arith.addf %286, %295 : vector<16x128xf32>
    %c124_i32_130 = arith.constant 124 : i32
    %297 = tpu.dynamic_rotate %264 by %c124_i32_130 dim 1 : vector<16x128xf32>, i32 -> vector<16x128xf32>
    %cst_131 = arith.constant 0.000000e+00 : f32
    %298 = vector.broadcast %cst_131 : f32 to vector<16x128xf32>
    %299 = arith.select %31, %297, %298 : vector<16x128xi1>, vector<16x128xf32>
    %c4_i32_132 = arith.constant 4 : i32
    %300 = tpu.dynamic_rotate %264 by %c4_i32_132 dim 1 : vector<16x128xf32>, i32 -> vector<16x128xf32>
    %cst_133 = arith.constant 0.000000e+00 : f32
    %301 = vector.broadcast %cst_133 : f32 to vector<16x128xf32>
    %302 = arith.select %41, %300, %301 : vector<16x128xi1>, vector<16x128xf32>
    %303 = arith.addf %299, %302 : vector<16x128xf32>
    %cst_134 = arith.constant 0.00759875821 : f32
    %304 = vector.broadcast %cst_134 : f32 to vector<16x128xf32>
    %305 = arith.mulf %304, %303 : vector<16x128xf32>
    %306 = arith.addf %296, %305 : vector<16x128xf32>
    %c123_i32_135 = arith.constant 123 : i32
    %307 = tpu.dynamic_rotate %264 by %c123_i32_135 dim 1 : vector<16x128xf32>, i32 -> vector<16x128xf32>
    %cst_136 = arith.constant 0.000000e+00 : f32
    %308 = vector.broadcast %cst_136 : f32 to vector<16x128xf32>
    %309 = arith.select %33, %307, %308 : vector<16x128xi1>, vector<16x128xf32>
    %c5_i32_137 = arith.constant 5 : i32
    %310 = tpu.dynamic_rotate %264 by %c5_i32_137 dim 1 : vector<16x128xf32>, i32 -> vector<16x128xf32>
    %cst_138 = arith.constant 0.000000e+00 : f32
    %311 = vector.broadcast %cst_138 : f32 to vector<16x128xf32>
    %312 = arith.select %43, %310, %311 : vector<16x128xi1>, vector<16x128xf32>
    %313 = arith.addf %309, %312 : vector<16x128xf32>
    %cst_139 = arith.constant 0.00102838012 : f32
    %314 = vector.broadcast %cst_139 : f32 to vector<16x128xf32>
    %315 = arith.mulf %314, %313 : vector<16x128xf32>
    %316 = arith.addf %306, %315 : vector<16x128xf32>
    %317 = arith.mulf %97, %97 : vector<16x128xf32>
    %318 = arith.mulf %151, %151 : vector<16x128xf32>
    %319 = arith.mulf %97, %151 : vector<16x128xf32>
    %320 = arith.subf %206, %317 : vector<16x128xf32>
    %321 = arith.subf %261, %318 : vector<16x128xf32>
    %322 = arith.subf %316, %319 : vector<16x128xf32>
    %cst_140 = arith.constant 2.000000e+00 : f32
    %323 = vector.broadcast %cst_140 : f32 to vector<16x128xf32>
    %324 = arith.mulf %323, %319 : vector<16x128xf32>
    %cst_141 = arith.constant 9.99999974E-5 : f32
    %325 = vector.broadcast %cst_141 : f32 to vector<16x128xf32>
    %326 = arith.addf %324, %325 : vector<16x128xf32>
    %cst_142 = arith.constant 2.000000e+00 : f32
    %327 = vector.broadcast %cst_142 : f32 to vector<16x128xf32>
    %328 = arith.mulf %327, %322 : vector<16x128xf32>
    %cst_143 = arith.constant 8.99999984E-4 : f32
    %329 = vector.broadcast %cst_143 : f32 to vector<16x128xf32>
    %330 = arith.addf %328, %329 : vector<16x128xf32>
    %331 = arith.mulf %326, %330 : vector<16x128xf32>
    %332 = arith.addf %317, %318 : vector<16x128xf32>
    %cst_144 = arith.constant 9.99999974E-5 : f32
    %333 = vector.broadcast %cst_144 : f32 to vector<16x128xf32>
    %334 = arith.addf %332, %333 : vector<16x128xf32>
    %335 = arith.addf %320, %321 : vector<16x128xf32>
    %cst_145 = arith.constant 8.99999984E-4 : f32
    %336 = vector.broadcast %cst_145 : f32 to vector<16x128xf32>
    %337 = arith.addf %335, %336 : vector<16x128xf32>
    %338 = arith.mulf %334, %337 : vector<16x128xf32>
    %339 = tpu.reciprocal %338 {approx = true} : vector<16x128xf32> -> vector<16x128xf32>
    %340 = arith.mulf %331, %339 : vector<16x128xf32>
    %341 = arith.subf %3, %4 : vector<16x128xf32>
    %c127_i32_146 = arith.constant 127 : i32
    %342 = tpu.dynamic_rotate %341 by %c127_i32_146 dim 1 : vector<16x128xf32>, i32 -> vector<16x128xf32>
    %343 = arith.subf %342, %341 : vector<16x128xf32>
    %cst_147 = arith.constant 0.000000e+00 : f32
    %344 = vector.broadcast %cst_147 : f32 to vector<16x128xf32>
    %345 = arith.select %25, %343, %344 : vector<16x128xi1>, vector<16x128xf32>
    %c15_i32_148 = arith.constant 15 : i32
    %346 = vector.broadcast %c15_i32_148 : i32 to vector<16x128xi32>
    %347 = arith.cmpi slt, %7, %346 : vector<16x128xi32>
    %c15_i32_149 = arith.constant 15 : i32
    %348 = tpu.dynamic_rotate %341 by %c15_i32_149 dim 0 : vector<16x128xf32>, i32 -> vector<16x128xf32>
    %349 = arith.subf %348, %341 : vector<16x128xf32>
    %cst_150 = arith.constant 0.000000e+00 : f32
    %350 = vector.broadcast %cst_150 : f32 to vector<16x128xf32>
    %351 = arith.select %347, %349, %350 : vector<16x128xi1>, vector<16x128xf32>
    %c0_151 = arith.constant 0 : index
    %c0_152 = arith.constant 0 : index
    %352 = vector.load %arg6[%c0_151, %c0_152] : memref<16x128xf32, #tpu.memory_space<vmem>>, vector<16x128xf32>
    %353 = arith.mulf %341, %341 : vector<16x128xf32>
    %cst_153 = arith.constant 4.8828125E-4 : f32
    %354 = vector.broadcast %cst_153 : f32 to vector<16x128xf32>
    %355 = arith.mulf %354, %353 : vector<16x128xf32>
    %cst_154 = arith.constant 4.8828125E-4 : f32
    %356 = vector.broadcast %cst_154 : f32 to vector<16x128xf32>
    %357 = arith.mulf %356, %340 : vector<16x128xf32>
    %358 = arith.subf %355, %357 : vector<16x128xf32>
    %359 = arith.mulf %351, %351 : vector<16x128xf32>
    %cst_155 = arith.constant 5.20833346E-5 : f32
    %360 = vector.broadcast %cst_155 : f32 to vector<16x128xf32>
    %361 = arith.mulf %360, %359 : vector<16x128xf32>
    %362 = arith.addf %358, %361 : vector<16x128xf32>
    %363 = arith.mulf %345, %345 : vector<16x128xf32>
    %cst_156 = arith.constant 5.20833346E-5 : f32
    %364 = vector.broadcast %cst_156 : f32 to vector<16x128xf32>
    %365 = arith.mulf %364, %363 : vector<16x128xf32>
    %366 = arith.addf %362, %365 : vector<16x128xf32>
    %367 = arith.addf %352, %366 : vector<16x128xf32>
    %c0_157 = arith.constant 0 : index
    %c0_158 = arith.constant 0 : index
    %368 = vector.load %arg6[%c0_157, %c0_158] : memref<16x128xf32, #tpu.memory_space<vmem>>, vector<16x128xf32>
    tpu.vector_store %arg6[%c0_157, %c0_158], %367 {strides = array<i32>} : memref<16x128xf32, #tpu.memory_space<vmem>>, vector<16x128xf32>,
    %c0_i32_159 = arith.constant 0 : i32
    %369 = arith.cmpi eq, %arg1, %c0_i32_159 : i32
    %370 = arith.extui %369 : i1 to i32
    %c0_i32_160 = arith.constant 0 : i32
    %371 = arith.cmpi ne, %370, %c0_i32_160 : i32
    scf.if %371 {
      %c0_161 = arith.constant 0 : index
      %c0_162 = arith.constant 0 : index
      %372 = vector.load %arg6[%c0_161, %c0_162] : memref<16x128xf32, #tpu.memory_space<vmem>>, vector<16x128xf32>
      %cst_163 = arith.constant dense<0.000000e+00> : vector<16xf32>
      %373 = vector.multi_reduction <add>, %372, %cst_163 [1] : vector<16x128xf32> to vector<16xf32>
      %374 = vector.shape_cast %373 : vector<16xf32> to vector<16x1xf32>
      %cst_164 = arith.constant dense<0.000000e+00> : vector<1xf32>
      %375 = vector.multi_reduction <add>, %374, %cst_164 [0] : vector<16x1xf32> to vector<1xf32>
      %376 = vector.shape_cast %375 : vector<1xf32> to vector<1x1xf32>
      %c0_165 = arith.constant 0 : index
      %c0_166 = arith.constant 0 : index
      %c0_167 = arith.constant 0 : index
      %377 = vector.load %arg5[%c0_165, %c0_166, %c0_167] : memref<1x1x1xf32, #tpu.memory_space<vmem>>, vector<1x1x1xf32>
      %378 = vector.shape_cast %377 : vector<1x1x1xf32> to vector<1x1xf32>
      %379 = vector.shape_cast %376 : vector<1x1xf32> to vector<1x1x1xf32>
      tpu.vector_store %arg5[%c0_165, %c0_166, %c0_167], %379 {strides = array<i32>} : memref<1x1x1xf32, #tpu.memory_space<vmem>>, vector<1x1x1xf32>,
    } else {
    }
    return
  }
  func.func @transform_0(%arg0: i32, %arg1: i32) -> (i32, i32) {
    %c1_i32 = arith.constant 1 : i32
    %0 = arith.muli %arg0, %c1_i32 : i32
    %1 = arith.addi %0, %arg1 : i32
    %c0_i32 = arith.constant 0 : i32
    %c0_i32_0 = arith.constant 0 : i32
    return %c0_i32, %1 : i32, i32
  }
  func.func @transform_1(%arg0: i32, %arg1: i32) -> (i32, i32) {
    %c1_i32 = arith.constant 1 : i32
    %0 = arith.muli %arg0, %c1_i32 : i32
    %1 = arith.addi %0, %arg1 : i32
    %c0_i32 = arith.constant 0 : i32
    %c0_i32_0 = arith.constant 0 : i32
    return %c0_i32, %1 : i32, i32
  }
  func.func @transform_2(%arg0: i32, %arg1: i32) -> (i32, i32) {
    %c0_i32 = arith.constant 0 : i32
    %c0_i32_0 = arith.constant 0 : i32
    %c0_i32_1 = arith.constant 0 : i32
    return %c0_i32, %c0_i32_0 : i32, i32
  }
  func.func @transform_3(%arg0: i32, %arg1: i32) -> (i32, i32, i32) {
    %c0_i32 = arith.constant 0 : i32
    %c0_i32_0 = arith.constant 0 : i32
    %c0_i32_1 = arith.constant 0 : i32
    return %arg0, %c0_i32, %c0_i32_0 : i32, i32, i32
  }
}

</mosaic_0001>

<bundles_post_ra>
// kernel: content_loss.1
= control target key start
LH: loop header
LB: loop body
LE: loop exit
PB: predicated region body
PF: predicated region fallthrough
CT: control target
= control target key end

     0   :  { %8 = vsyncpa [#allocation4], 0  ;;  %s1703_s0 = inlined_call_operand.hbm [shape: f32[16,128], index: 0, kind: input, shape index: {}]   ;;  %s1704_s1 = inlined_call_operand.hbm [shape: f32[16,128], index: 1, kind: input, shape index: {}]   ;;  %s1705_s2 = inlined_call_operand.hbm [shape: bf16[16,16], index: 2, kind: input, shape index: {}]   ;;  %s1706_s3 = inlined_call_operand.hbm [shape: f32[1,1,1], index: 3, kind: output, shape index: {}]  }
   0x1   :  { %9 = vsyncpa [#allocation7], 0 }
   0x2   :  { %10 = vsyncpa [#allocation5], 0  ;;  %s1070_s12 = smov [#allocation6]   ;;  %s1071_s14 = smov [#allocation3]  }
   0x3   :  { %s34_s13 = sshll.u32 %s1070_s12, 4  ;;  %s19_s15 = sshll.u32 %s1071_s14, 4  ;;  %s35_s13 = int_to_ptr.vmem [resolvable:$true] %s34_s13  ;;  %s1109_s15 = int_to_ptr.vmem [resolvable:$true] %s19_s15 }
   0x4   :  { %s976_s18 = scalar_lea.hbm %s1704_s1, 256 }
   0x5   :  { %p977_p0 = scmp.ne.s32.totalorder %s1704_s1, %s976_s18  ;;  %p980_p1 = scmp.lt.u32.totalorder %s976_s18, %s1704_s1 }
   0x7   :  { %p982_p2 = pnand %p980_p1, %p977_p0 }
   0x9   :  { %985 = shalt.err (!%p982_p2)
}
   0xa   :  { %s986_s23 = scalar_lea.vmem %s35_s13, 256  ;;  %p991_p4 = scmp.lt.s32.totalorder %s35_s13, %s35_s13 }
   0xb   :  { %p987_p3 = scmp.ne.s32.totalorder %s35_s13, %s986_s23  ;;  %p992_p5 = scmp.lt.s32.totalorder %s986_s23, %s986_s23 }
   0xd   :  { %p993_p6 = por %p992_p5, %p991_p4 }
   0xf   :  { %p994_p7 = pnand %p993_p6, %p987_p3 }
  0x11   :  { %997 = shalt.err (!%p994_p7)
}
  0x12   :  { %s1072_s24 = smov 128   ;;  %s1073_s25 = smov 8  }
  0x13   :  { %40 = dma.hbm_to_vmem [thread:$0]  %s1704_s1, 256, %s35_s13, [#allocation7], %s1072_s24, %s1072_s24, %s1073_s25  }
  0x14   :  { %s998_s30 = scalar_lea.hbm %s1703_s0, 256 }
  0x15   :  { %p999_p8 = scmp.ne.s32.totalorder %s1703_s0, %s998_s30  ;;  %p1002_p9 = scmp.lt.u32.totalorder %s998_s30, %s1703_s0 }
  0x17   :  { %p1004_p10 = pnand %p1002_p9, %p999_p8 }
  0x19   :  { %1007 = shalt.err (!%p1004_p10)
}
  0x1a   :  { %s1008_s8 = scalar_lea.vmem %s1109_s15, 256  ;;  %p1013_p12 = scmp.lt.s32.totalorder %s1109_s15, %s1109_s15 }
  0x1b   :  { %p1009_p11 = scmp.ne.s32.totalorder %s1109_s15, %s1008_s8  ;;  %p1014_p13 = scmp.lt.s32.totalorder %s1008_s8, %s1008_s8 }
  0x1d   :  { %p1015_p0 = por %p1014_p13, %p1013_p12 }
  0x1f   :  { %p1016_p1 = pnand %p1015_p0, %p1009_p11 }
  0x21   :  { %1019 = shalt.err (!%p1016_p1)
}
  0x22   :  { %25 = dma.hbm_to_vmem [thread:$0]  %s1703_s0, 256, %s1109_s15, [#allocation4], %s1072_s24, %s1072_s24, %s1073_s25  }
  0x23   :  { %s1074_s10 = smov [#allocation8]   ;;  %s1020_s14 = scalar_lea.hbm %s1705_s2, 128 }
  0x24   :  { %s46_s11 = sshll.u32 %s1074_s10, 4  ;;  %p1021_p2 = scmp.ne.s32.totalorder %s1705_s2, %s1020_s14  ;;  %s47_s11 = int_to_ptr.vmem [resolvable:$true] %s46_s11 }
  0x25   :  { %p1024_p3 = scmp.lt.u32.totalorder %s1020_s14, %s1705_s2 }
  0x27   :  { %p1026_p4 = pnand %p1024_p3, %p1021_p2 }
  0x29   :  { %1029 = shalt.err (!%p1026_p4)
}
  0x2a   :  { %s1030_s20 = scalar_lea.vmem %s47_s11, 128  ;;  %p1035_p6 = scmp.lt.s32.totalorder %s47_s11, %s47_s11 }
  0x2b   :  { %p1031_p5 = scmp.ne.s32.totalorder %s47_s11, %s1030_s20  ;;  %p1036_p7 = scmp.lt.s32.totalorder %s1030_s20, %s1030_s20 }
  0x2d   :  { %p1037_p8 = por %p1036_p7, %p1035_p6 }
  0x2f   :  { %p1038_p9 = pnand %p1037_p8, %p1031_p5 }
  0x31   :  { %1041 = shalt.err (!%p1038_p9)
}
  0x32   :  { %s1075_s0 = smov 64   ;;  %s1076_s15 = smov 4  }
  0x33   :  { %52 = dma.hbm_to_vmem [thread:$0]  %s1705_s2, 128, %s47_s11, [#allocation7], %s1075_s0, %s1075_s0, %s1076_s15  }
  0x34   :  { %1064 = dma.done.wait [#allocation4], 256  }
  0x35   :  { %1065 = vsyncadd [#allocation4], 4294967040 }
  0x36   :  { %1066 = dma.done.wait [#allocation7], 384  }
  0x37   :  { %1067 = vsyncadd [#allocation7], 4294966912  ;;  %v1077_v0 = vmov 0.0   ;;  %vm1078_vm0 = vmmov 0   ;;  %v71_v1 = vld [vmem:[#allocation3] sm:$0xff]  ;;  %v72_v2 = vld [vmem:[#allocation3 + $0x8] sm:$0xff]  ;;  %v77_v39 = vlaneseq }
  0x38   :  { %922 = vmatprep.subr.bf16.mxu0 %v1077_v0  ;;  %924 = vmatprep.mubr.msk.bf16.mxu0 %vm1078_vm0, %v1077_v0  ;;  %v104_v3 = vpack.c.bf16 %v72_v2, %v71_v1  ;;  %v73_v4 = vld [vmem:[#allocation6] sm:$0xff]  ;;  %v381_v5 = vmul.f32 %v71_v1, %v71_v1  ;;  %v382_v6 = vmul.f32 %v72_v2, %v72_v2  ;;  %v971_v7 = vld [vmem:[#allocation8] sm:$0xff]   ;;  %vm110_vm1 = vcmask 130048   ;;  %v74_v8 = vld [vmem:[#allocation6 + $0x8] sm:$0xff]  ;;  %s1079_s2 = smov 1   ;;  %s1080_s23 = smov 127  }
  0x39   :  { %928 = vmatprep.subr.bf16.mxu1 %v1077_v0  ;;  %930 = vmatprep.mubr.msk.bf16.mxu1 %vm1078_vm0, %v1077_v0  ;;  %v1155_v9 = vsub.f32 %v71_v1, %v73_v4  ;;  %v517_v10 = vmul.f32 %v73_v4, %v73_v4  ;;  %v247_v11 = vpack.c.bf16 %v74_v8, %v73_v4  ;;  %s1081_s24 = smov 126   ;;  %s1082_s25 = smov 2   ;;  %v78_v40 = vand.u32 127, %v77_v39 }
  0x3a   :  { %923 = vmatpush3.bf16.msra.mxu0 %v104_v3  ;;  %v1157_v12 = vsub.f32 %v72_v2, %v74_v8  ;;  %v383_v13 = vpack.c.bf16 %v382_v6, %v381_v5  ;;  %v518_v14 = vmul.f32 %v74_v8, %v74_v8  ;;  %v653_v16 = vmul.f32 %v73_v4, %v71_v1  ;;  %s1083_s26 = smov 125   ;;  %s1084_s27 = smov 3  }
  0x3b   :  { %934 = vmatprep.subr.bf16.mxu0 %v1077_v0  ;;  %929 = vmatpush3.bf16.msra.mxu1 %v247_v11  ;;  %v654_v17 = vmul.f32 %v74_v8, %v72_v2  ;;  %s1085_s28 = smov 124   ;;  %s1086_s29 = smov 123   ;;  %v1304_v41 = vand.u32 15, %v78_v40  ;;  %vm888_vm14 = vcmask 0  }
  0x3c   :  { %v519_v15 = vpack.c.bf16 %v518_v14, %v517_v10  ;;  %940 = vmatprep.subr.bf16.mxu1 %v1077_v0  ;;  %s1087_s30 = smov 5   ;;  %s1088_s4 = smov [#allocation9]  }
  0x3d   :  { %925 = vmatmul.mubr.msk.bf16.vlgmr.msra.gmra.mrb[0].mxu0 %vm110_vm1, %v971_v7  ;;  %v655_v18 = vpack.c.bf16 %v654_v17, %v653_v16  ;;  %vm99_vm2 = vcmp.ge.s32.totalorder %v1304_v41, 1  ;;  %vm94_vm3 = vcmp.lt.s32.totalorder %v1304_v41, 15  ;;  %vm100_vm4 = vcmp.ge.s32.totalorder %v1304_v41, 2  ;;  %s896_s5 = sshll.u32 %s1088_s4, 4  ;;  %s897_s5 = int_to_ptr.vmem [resolvable:$true] %s896_s5 }
  0x3e   :  { %935 = vmatpush3.bf16.msra.mxu0 %v383_v13  ;;  %936 = vmatprep.mubr.msk.bf16.mxu0 %vm1078_vm0, %v1077_v0  ;;  %vm95_vm5 = vcmp.lt.s32.totalorder %v1304_v41, 14  ;;  %vm96_vm6 = vcmp.lt.s32.totalorder %v1304_v41, 13  ;;  %vm101_vm7 = vcmp.ge.s32.totalorder %v1304_v41, 3  ;;  %vm97_vm8 = vcmp.lt.s32.totalorder %v1304_v41, 12  ;;  %s1042_s6 = scalar_lea.vmem %s897_s5, 16  ;;  %s1046_s7 = scalar_lea.vmem %s897_s5, 32 }
  0x3f   :  { %931 = vmatmul.mubr.msk.bf16.vlgmr.msra.gmra.mrb[0].mxu1 %vm110_vm1, %v971_v7  ;;  %946 = vmatprep.subr.bf16.mxu0 %v1077_v0  ;;  %vm102_vm9 = vcmp.ge.s32.totalorder %v1304_v41, 4  ;;  %vm98_vm10 = vcmp.lt.s32.totalorder %v1304_v41, 11  ;;  %vm103_vm11 = vcmp.ge.s32.totalorder %v1304_v41, 5  ;;  %p1043_p10 = scmp.ne.s32.totalorder %s897_s5, %s1042_s6  ;;  %p1047_p11 = scmp.lt.s32.totalorder %s897_s5, %s897_s5 }
  0x40   :  { %941 = vmatpush3.bf16.msra.mxu1 %v519_v15  ;;  %942 = vmatprep.mubr.msk.bf16.mxu1 %vm1078_vm0, %v1077_v0  ;;  %p1048_p12 = scmp.lt.s32.totalorder %s1046_s7, %s1042_s6 }
  0x42   :  { %p1049_p13 = por %p1048_p12, %p1047_p11 }
  0x44   :  { %p1050_p0 = pnand %p1049_p13, %p1043_p10 }
  0x45   :  { %937 = vmatmul.mubr.msk.bf16.vlgmr.msra.gmra.mrb[4].mxu0 %vm110_vm1, %v971_v7 }
  0x46   :  { %947 = vmatpush3.bf16.msra.mxu0 %v655_v18  ;;  %948 = vmatprep.mubr.msk.bf16.mxu0 %vm1078_vm0, %v1077_v0 }
  0x47   :  { %943 = vmatmul.mubr.msk.bf16.vlgmr.msra.gmra.mrb[4].mxu1 %vm110_vm1, %v971_v7 }
  0x4d   :  { %949 = vmatmul.mubr.msk.bf16.vlgmr.msra.gmra.mrb[8].mxu0 %vm110_vm1, %v971_v7 }
 0x110   :  { %v1167_v19 = vpop.f32.mrb[0].mxu0 }
 0x111   :  { %163 = vrot.lane.b32.xlu1 %v1167_v19, %s1079_s2  ;;  %157 = vrot.lane.b32.xlu0 %v1167_v19, %s1080_s23  ;;  %v926_v20 = vpop.f32.mrb[1].mxu0  ;;  %v155_v57 = vmul.f32 0.26601171, %v1167_v19 }
 0x112   :  { %v1173_v21 = vpop.f32.mrb[2].mxu0  ;;  %v1175_v22 = vpop.f32.mrb[0].mxu1 }
 0x113   :  { %v927_v23 = vpop.f32.mrb[3].mxu0  ;;  %v932_v24 = vpop.f32.mrb[1].mxu1 }
 0x114   :  { %v1177_v25 = vpop.f32.mrb[2].mxu1 }
 0x115   :  { %175 = vrot.lane.b32.xlu0 %v1167_v19, %s1081_s24  ;;  %165 = vrot.lane.b32.xlu1 %v1173_v21, %s1079_s2  ;;  %v933_v26 = vpop.f32.mrb[3].mxu1 }
 0x118   :  { %v1183_v27 = vpop.f32.mrb[4].mxu0 }
 0x119   :  { %181 = vrot.lane.b32.xlu0 %v1167_v19, %s1082_s25  ;;  %177 = vrot.lane.b32.xlu1 %v1173_v21, %s1081_s24  ;;  %v938_v28 = vpop.f32.mrb[5].mxu0 }
 0x11a   :  { %v1189_v29 = vpop.f32.mrb[6].mxu0  ;;  %v1191_v30 = vpop.f32.mrb[4].mxu1 }
 0x11b   :  { %v939_v31 = vpop.f32.mrb[7].mxu0  ;;  %v944_v32 = vpop.f32.mrb[5].mxu1 }
 0x11c   :  { %v1193_v33 = vpop.f32.mrb[6].mxu1 }
 0x11d   :  { %193 = vrot.lane.b32.xlu0 %v1167_v19, %s1083_s26  ;;  %183 = vrot.lane.b32.xlu1 %v1173_v21, %s1082_s25  ;;  %v945_v34 = vpop.f32.mrb[7].mxu1 }
 0x120   :  { %v1211_v35 = vpop.f32.mrb[8].mxu0 }
 0x121   :  { %199 = vrot.lane.b32.xlu0 %v1167_v19, %s1084_s27  ;;  %195 = vrot.lane.b32.xlu1 %v1173_v21, %s1083_s26  ;;  %v950_v36 = vpop.f32.mrb[9].mxu0 }
 0x122   :  { %v1217_v37 = vpop.f32.mrb[10].mxu0  ;;  %v289_v36 = vmul.f32 0.26601171, %v1175_v22 }
 0x123   :  { %v951_v38 = vpop.f32.mrb[11].mxu0 }
 0x125   :  { %211 = vrot.lane.b32.xlu0 %v1167_v19, %s1085_s28  ;;  %201 = vrot.lane.b32.xlu1 %v1173_v21, %s1084_s27 }
 0x129   :  { %217 = vrot.lane.b32.xlu0 %v1167_v19, %s1076_s15  ;;  %213 = vrot.lane.b32.xlu1 %v1173_v21, %s1085_s28 }
 0x12d   :  { %291 = vrot.lane.b32.xlu0 %v1175_v22, %s1080_s23  ;;  %219 = vrot.lane.b32.xlu1 %v1173_v21, %s1076_s15 }
 0x131   :  { %297 = vrot.lane.b32.xlu0 %v1175_v22, %s1079_s2  ;;  %293 = vrot.lane.b32.xlu1 %v1177_v25, %s1080_s23 }
 0x135   :  { %309 = vrot.lane.b32.xlu0 %v1175_v22, %s1081_s24  ;;  %299 = vrot.lane.b32.xlu1 %v1177_v25, %s1079_s2 }
 0x139   :  { %315 = vrot.lane.b32.xlu0 %v1175_v22, %s1082_s25  ;;  %311 = vrot.lane.b32.xlu1 %v1177_v25, %s1081_s24 }
 0x13d   :  { %327 = vrot.lane.b32.xlu0 %v1175_v22, %s1083_s26  ;;  %317 = vrot.lane.b32.xlu1 %v1177_v25, %s1082_s25 }
 0x141   :  { %333 = vrot.lane.b32.xlu0 %v1175_v22, %s1084_s27  ;;  %329 = vrot.lane.b32.xlu1 %v1177_v25, %s1083_s26 }
 0x145   :  { %345 = vrot.lane.b32.xlu0 %v1175_v22, %s1085_s28  ;;  %335 = vrot.lane.b32.xlu1 %v1177_v25, %s1084_s27 }
 0x149   :  { %351 = vrot.lane.b32.xlu0 %v1175_v22, %s1076_s15  ;;  %347 = vrot.lane.b32.xlu1 %v1177_v25, %s1085_s28 }
 0x14d   :  { %229 = vrot.lane.b32.xlu0 %v1167_v19, %s1086_s29  ;;  %353 = vrot.lane.b32.xlu1 %v1177_v25, %s1076_s15 }
 0x151   :  { %235 = vrot.lane.b32.xlu0 %v1167_v19, %s1087_s30  ;;  %231 = vrot.lane.b32.xlu1 %v1173_v21, %s1086_s29 }
 0x155   :  { %363 = vrot.lane.b32.xlu0 %v1175_v22, %s1086_s29  ;;  %237 = vrot.lane.b32.xlu1 %v1173_v21, %s1087_s30 }
 0x159   :  { %369 = vrot.lane.b32.xlu0 %v1175_v22, %s1087_s30  ;;  %365 = vrot.lane.b32.xlu1 %v1177_v25, %s1086_s29 }
 0x15d   :  { %371 = vrot.lane.b32.xlu1 %v1177_v25, %s1087_s30  ;;  %159 = vrot.lane.b32.xlu0 %v1173_v21, %s1080_s23 }
 0x161   :  { %427 = vrot.lane.b32.xlu0 %v1183_v27, %s1080_s23  ;;  %429 = vrot.lane.b32.xlu1 %v1189_v29, %s1080_s23 }
 0x165   :  { %433 = vrot.lane.b32.xlu0 %v1183_v27, %s1079_s2  ;;  %435 = vrot.lane.b32.xlu1 %v1189_v29, %s1079_s2 }
 0x169   :  { %563 = vrot.lane.b32.xlu0 %v1191_v30, %s1080_s23  ;;  %565 = vrot.lane.b32.xlu1 %v1193_v33, %s1080_s23 }
 0x16d   :  { %569 = vrot.lane.b32.xlu0 %v1191_v30, %s1079_s2  ;;  %571 = vrot.lane.b32.xlu1 %v1193_v33, %s1079_s2 }
 0x171   :  { %445 = vrot.lane.b32.xlu0 %v1183_v27, %s1081_s24  ;;  %447 = vrot.lane.b32.xlu1 %v1189_v29, %s1081_s24 }
 0x175   :  { %451 = vrot.lane.b32.xlu0 %v1183_v27, %s1082_s25  ;;  %453 = vrot.lane.b32.xlu1 %v1189_v29, %s1082_s25 }
 0x179   :  { %581 = vrot.lane.b32.xlu0 %v1191_v30, %s1081_s24  ;;  %583 = vrot.lane.b32.xlu1 %v1193_v33, %s1081_s24 }
 0x17d   :  { %587 = vrot.lane.b32.xlu0 %v1191_v30, %s1082_s25  ;;  %589 = vrot.lane.b32.xlu1 %v1193_v33, %s1082_s25 }
 0x181   :  { %463 = vrot.lane.b32.xlu0 %v1183_v27, %s1083_s26  ;;  %465 = vrot.lane.b32.xlu1 %v1189_v29, %s1083_s26 }
 0x183   :  { %v164_v42 = vpop.permute.xlu1 %163  ;;  %v158_v43 = vpop.permute.xlu0 %157 }
 0x184   :  { %v167_v46 = vsel %vm99_vm2, %v164_v42, 0.0  ;;  %v161_v47 = vsel %vm94_vm3, %v158_v43, 0.0 }
 0x185   :  { %469 = vrot.lane.b32.xlu0 %v1183_v27, %s1084_s27  ;;  %471 = vrot.lane.b32.xlu1 %v1189_v29, %s1084_s27  ;;  %v169_v51 = vadd.f32 %v167_v46, %v161_v47 }
 0x187   :  { %v176_v44 = vpop.permute.xlu0 %175  ;;  %v1312_v45 = vpop.permute.xlu1 %165  ;;  %v171_v56 = vmul.f32 0.21300554, %v169_v51 }
 0x188   :  { %v179_v52 = vsel %vm95_vm5, %v176_v44, 0.0 }
 0x189   :  { %599 = vrot.lane.b32.xlu0 %v1191_v30, %s1083_s26  ;;  %601 = vrot.lane.b32.xlu1 %v1193_v33, %s1083_s26  ;;  %v173_v63 = vadd.f32 %v171_v56, %v155_v57 }
 0x18b   :  { %v182_v48 = vpop.permute.xlu0 %181  ;;  %v1324_v49 = vpop.permute.xlu1 %177 }
 0x18c   :  { %v185_v50 = vsel %vm100_vm4, %v182_v48, 0.0  ;;  %v290_v48 = vmul.f32 0.26601171, %v1177_v25 }
 0x18d   :  { %605 = vrot.lane.b32.xlu0 %v1191_v30, %s1084_s27  ;;  %607 = vrot.lane.b32.xlu1 %v1193_v33, %s1084_s27  ;;  %v187_v53 = vadd.f32 %v185_v50, %v179_v52 }
 0x18f   :  { %v194_v54 = vpop.permute.xlu0 %193  ;;  %v1334_v55 = vpop.permute.xlu1 %183  ;;  %v189_v58 = vmul.f32 0.10936069, %v187_v53 }
 0x190   :  { %v197_v61 = vsel %vm96_vm6, %v194_v54, 0.0 }
 0x191   :  { %481 = vrot.lane.b32.xlu0 %v1183_v27, %s1085_s28  ;;  %483 = vrot.lane.b32.xlu1 %v1189_v29, %s1085_s28  ;;  %v191_v1 = vadd.f32 %v189_v58, %v173_v63 }
 0x193   :  { %v200_v59 = vpop.permute.xlu0 %199  ;;  %v196_v60 = vpop.permute.xlu1 %195 }
 0x194   :  { %v203_v62 = vsel %vm101_vm7, %v200_v59, 0.0  ;;  %v198_v5 = vsel %vm96_vm6, %v196_v60, 0.0 }
 0x195   :  { %v205_v0 = vadd.f32 %v203_v62, %v197_v61  ;;  %487 = vrot.lane.b32.xlu0 %v1183_v27, %s1076_s15  ;;  %489 = vrot.lane.b32.xlu1 %v1189_v29, %s1076_s15 }
 0x197   :  { %v207_v2 = vmul.f32 0.036000773, %v205_v0  ;;  %v212_v3 = vpop.permute.xlu0 %211  ;;  %v202_v4 = vpop.permute.xlu1 %201 }
 0x198   :  { %v204_v6 = vsel %vm101_vm7, %v202_v4, 0.0  ;;  %v215_v13 = vsel %vm97_vm8, %v212_v3, 0.0 }
 0x199   :  { %v209_v7 = vadd.f32 %v207_v2, %v191_v1  ;;  %v1356_v8 = vadd.f32 %v204_v6, %v198_v5  ;;  %617 = vrot.lane.b32.xlu0 %v1191_v30, %s1085_s28  ;;  %619 = vrot.lane.b32.xlu1 %v1193_v33, %s1085_s28 }
 0x19b   :  { %v218_v10 = vpop.permute.xlu0 %217  ;;  %v214_v11 = vpop.permute.xlu1 %213 }
 0x19c   :  { %v221_v14 = vsel %vm102_vm9, %v218_v10, 0.0  ;;  %v216_v19 = vsel %vm97_vm8, %v214_v11, 0.0 }
 0x19d   :  { %v223_v15 = vadd.f32 %v221_v14, %v215_v13  ;;  %623 = vrot.lane.b32.xlu0 %v1191_v30, %s1076_s15  ;;  %625 = vrot.lane.b32.xlu1 %v1193_v33, %s1076_s15 }
 0x19f   :  { %v225_v16 = vmul.f32 0.007598758, %v223_v15  ;;  %v292_v17 = vpop.permute.xlu0 %291  ;;  %v220_v18 = vpop.permute.xlu1 %219 }
 0x1a0   :  { %v222_v20 = vsel %vm102_vm9, %v220_v18, 0.0  ;;  %v295_v31 = vsel %vm94_vm3, %v292_v17, 0.0 }
 0x1a1   :  { %v1375_v23 = vadd.f32 %v225_v16, %v209_v7  ;;  %v1377_v24 = vadd.f32 %v222_v20, %v216_v19  ;;  %499 = vrot.lane.b32.xlu0 %v1183_v27, %s1086_s29  ;;  %501 = vrot.lane.b32.xlu1 %v1189_v29, %s1086_s29 }
 0x1a3   :  { %v298_v26 = vpop.permute.xlu0 %297  ;;  %v294_v28 = vpop.permute.xlu1 %293 }
 0x1a4   :  { %v301_v32 = vsel %vm99_vm2, %v298_v26, 0.0  ;;  %v296_v43 = vsel %vm94_vm3, %v294_v28, 0.0 }
 0x1a5   :  { %v303_v34 = vadd.f32 %v301_v32, %v295_v31  ;;  %505 = vrot.lane.b32.xlu0 %v1183_v27, %s1087_s30  ;;  %507 = vrot.lane.b32.xlu1 %v1189_v29, %s1087_s30 }
 0x1a7   :  { %v305_v38 = vmul.f32 0.21300554, %v303_v34  ;;  %v310_v40 = vpop.permute.xlu0 %309  ;;  %v300_v42 = vpop.permute.xlu1 %299 }
 0x1a8   :  { %v302_v44 = vsel %vm99_vm2, %v300_v42, 0.0  ;;  %v313_v52 = vsel %vm95_vm5, %v310_v40, 0.0 }
 0x1a9   :  { %v307_v46 = vadd.f32 %v305_v38, %v289_v36  ;;  %v304_v47 = vadd.f32 %v302_v44, %v296_v43  ;;  %635 = vrot.lane.b32.xlu0 %v1191_v30, %s1086_s29  ;;  %637 = vrot.lane.b32.xlu1 %v1193_v33, %s1086_s29 }
 0x1ab   :  { %v306_v22 = vmul.f32 0.21300554, %v304_v47  ;;  %v316_v50 = vpop.permute.xlu0 %315  ;;  %v312_v51 = vpop.permute.xlu1 %311 }
 0x1ac   :  { %v319_v53 = vsel %vm100_vm4, %v316_v50, 0.0  ;;  %v314_v59 = vsel %vm95_vm5, %v312_v51, 0.0 }
 0x1ad   :  { %v308_v54 = vadd.f32 %v306_v22, %v290_v48  ;;  %v321_v56 = vadd.f32 %v319_v53, %v313_v52  ;;  %641 = vrot.lane.b32.xlu0 %v1191_v30, %s1087_s30  ;;  %643 = vrot.lane.b32.xlu1 %v1193_v33, %s1087_s30 }
 0x1af   :  { %v323_v57 = vmul.f32 0.10936069, %v321_v56  ;;  %v328_v58 = vpop.permute.xlu0 %327  ;;  %v318_v25 = vpop.permute.xlu1 %317 }
 0x1b0   :  { %v320_v60 = vsel %vm100_vm4, %v318_v25, 0.0  ;;  %v331_v2 = vsel %vm96_vm6, %v328_v58, 0.0 }
 0x1b1   :  { %v325_v61 = vadd.f32 %v323_v57, %v307_v46  ;;  %v322_v62 = vadd.f32 %v320_v60, %v314_v59  ;;  %699 = vrot.lane.b32.xlu0 %v1211_v35, %s1080_s23  ;;  %701 = vrot.lane.b32.xlu1 %v1217_v37, %s1080_s23 }
 0x1b3   :  { %v324_v63 = vmul.f32 0.10936069, %v322_v62  ;;  %v334_v0 = vpop.permute.xlu0 %333  ;;  %v330_v1 = vpop.permute.xlu1 %329  ;;  %v186_v62 = vsel %vm100_vm4, %v1334_v55, 0.0 }
 0x1b4   :  { %v337_v3 = vsel %vm101_vm7, %v334_v0, 0.0  ;;  %v332_v11 = vsel %vm96_vm6, %v330_v1, 0.0  ;;  %v180_v0 = vsel %vm95_vm5, %v1324_v49, 0.0 }
 0x1b5   :  { %v326_v4 = vadd.f32 %v324_v63, %v308_v54  ;;  %v339_v5 = vadd.f32 %v337_v3, %v331_v2  ;;  %705 = vrot.lane.b32.xlu0 %v1211_v35, %s1079_s2  ;;  %707 = vrot.lane.b32.xlu1 %v1217_v37, %s1079_s2  ;;  %v168_v63 = vsel %vm99_vm2, %v1312_v45, 0.0 }
 0x1b7   :  { %v341_v6 = vmul.f32 0.036000773, %v339_v5  ;;  %v346_v7 = vpop.permute.xlu0 %345  ;;  %v336_v10 = vpop.permute.xlu1 %335 }
 0x1b8   :  { %v338_v13 = vsel %vm101_vm7, %v336_v10, 0.0  ;;  %v349_v19 = vsel %vm97_vm8, %v346_v7, 0.0 }
 0x1b9   :  { %v343_v14 = vadd.f32 %v341_v6, %v325_v61  ;;  %v340_v15 = vadd.f32 %v338_v13, %v332_v11  ;;  %717 = vrot.lane.b32.xlu0 %v1211_v35, %s1081_s24  ;;  %719 = vrot.lane.b32.xlu1 %v1217_v37, %s1081_s24  ;;  %v156_v11 = vmul.f32 0.26601171, %v1173_v21  ;;  %v208_v21 = vmul.f32 0.036000773, %v1356_v8 }
 0x1bb   :  { %v342_v16 = vmul.f32 0.036000773, %v340_v15  ;;  %v352_v17 = vpop.permute.xlu0 %351  ;;  %v348_v18 = vpop.permute.xlu1 %347 }
 0x1bc   :  { %v355_v20 = vsel %vm102_vm9, %v352_v17, 0.0  ;;  %v350_v36 = vsel %vm97_vm8, %v348_v18, 0.0 }
 0x1bd   :  { %v344_v26 = vadd.f32 %v342_v16, %v326_v4  ;;  %v357_v28 = vadd.f32 %v355_v20, %v349_v19  ;;  %723 = vrot.lane.b32.xlu0 %v1211_v35, %s1082_s25  ;;  %725 = vrot.lane.b32.xlu1 %v1217_v37, %s1082_s25  ;;  %v188_v4 = vadd.f32 %v186_v62, %v180_v0 }
 0x1bf   :  { %v359_v31 = vmul.f32 0.007598758, %v357_v28  ;;  %v230_v32 = vpop.permute.xlu0 %229  ;;  %v354_v34 = vpop.permute.xlu1 %353  ;;  %v190_v19 = vmul.f32 0.10936069, %v188_v4  ;;  %v562_v4 = vmul.f32 0.26601171, %v1193_v33 }
 0x1c0   :  { %v356_v38 = vsel %vm102_vm9, %v354_v34, 0.0  ;;  %v233_v47 = vsel %vm98_vm10, %v230_v32, 0.0 }
 0x1c1   :  { %v361_v40 = vadd.f32 %v359_v31, %v343_v14  ;;  %v358_v42 = vadd.f32 %v356_v38, %v350_v36  ;;  %735 = vrot.lane.b32.xlu0 %v1211_v35, %s1083_s26  ;;  %737 = vrot.lane.b32.xlu1 %v1217_v37, %s1083_s26 }
 0x1c3   :  { %v360_v43 = vmul.f32 0.007598758, %v358_v42  ;;  %v236_v44 = vpop.permute.xlu0 %235  ;;  %v232_v46 = vpop.permute.xlu1 %231 }
 0x1c4   :  { %v239_v48 = vsel %vm103_vm11, %v236_v44, 0.0  ;;  %v234_v54 = vsel %vm98_vm10, %v232_v46, 0.0 }
 0x1c5   :  { %v362_v22 = vadd.f32 %v360_v43, %v344_v26  ;;  %v241_v50 = vadd.f32 %v239_v48, %v233_v47  ;;  %741 = vrot.lane.b32.xlu0 %v1211_v35, %s1084_s27  ;;  %743 = vrot.lane.b32.xlu1 %v1217_v37, %s1084_s27  ;;  %v226_v43 = vmul.f32 0.007598758, %v1377_v24  ;;  %v425_v47 = vmul.f32 0.26601171, %v1183_v27 }
 0x1c6   :  { %v426_v48 = vmul.f32 0.26601171, %v1189_v29 }
 0x1c7   :  { %v243_v51 = vmul.f32 0.0010283801, %v241_v50  ;;  %v364_v52 = vpop.permute.xlu0 %363  ;;  %v238_v53 = vpop.permute.xlu1 %237 }
 0x1c8   :  { %v240_v56 = vsel %vm103_vm11, %v238_v53, 0.0  ;;  %v367_v60 = vsel %vm98_vm10, %v364_v52, 0.0 }
 0x1c9   :  { %v245_v57 = vadd.f32 %v243_v51, %v1375_v23  ;;  %v242_v58 = vadd.f32 %v240_v56, %v234_v54  ;;  %753 = vrot.lane.b32.xlu0 %v1211_v35, %s1085_s28  ;;  %755 = vrot.lane.b32.xlu1 %v1217_v37, %s1085_s28 }
 0x1cb   :  { %v370_v25 = vpop.permute.xlu0 %369  ;;  %v366_v59 = vpop.permute.xlu1 %365  ;;  %v1495_v49 = vmul.f32 %v245_v57, %v245_v57 }
 0x1cc   :  { %v373_v61 = vsel %vm103_vm11, %v370_v25, 0.0  ;;  %v368_v55 = vsel %vm98_vm10, %v366_v59, 0.0 }
 0x1cd   :  { %v375_v23 = vadd.f32 %v373_v61, %v367_v60  ;;  %759 = vrot.lane.b32.xlu0 %v1211_v35, %s1076_s15  ;;  %761 = vrot.lane.b32.xlu1 %v1217_v37, %s1076_s15 }
 0x1cf   :  { %v377_v1 = vmul.f32 0.0010283801, %v375_v23  ;;  %v372_v2 = vpop.permute.xlu1 %371  ;;  %v160_v3 = vpop.permute.xlu0 %159 }
 0x1d0   :  { %v374_v5 = vsel %vm103_vm11, %v372_v2, 0.0  ;;  %v162_v6 = vsel %vm94_vm3, %v160_v3, 0.0  ;;  %v561_v2 = vmul.f32 0.26601171, %v1191_v30 }
 0x1d1   :  { %v379_v7 = vadd.f32 %v377_v1, %v361_v40  ;;  %v376_v10 = vadd.f32 %v374_v5, %v368_v55  ;;  %v170_v45 = vadd.f32 %v168_v63, %v162_v6  ;;  %771 = vrot.lane.b32.xlu0 %v1211_v35, %s1086_s29  ;;  %773 = vrot.lane.b32.xlu1 %v1217_v37, %s1086_s29 }
 0x1d3   :  { %v1498_v13 = vmul.f32 %v379_v7, %v379_v7  ;;  %v1500_v14 = vmul.f32 %v379_v7, %v245_v57  ;;  %v378_v15 = vmul.f32 0.0010283801, %v376_v10  ;;  %v172_v16 = vmul.f32 0.21300554, %v170_v45  ;;  %v428_v17 = vpop.permute.xlu0 %427  ;;  %v430_v18 = vpop.permute.xlu1 %429 }
 0x1d4   :  { %v431_v36 = vsel %vm94_vm3, %v428_v17, 0.0  ;;  %v432_v38 = vsel %vm94_vm3, %v430_v18, 0.0 }
 0x1d5   :  { %v1504_v20 = vadd.f32 %v1498_v13, %v1495_v49  ;;  %v380_v26 = vadd.f32 %v378_v15, %v362_v22  ;;  %v174_v28 = vadd.f32 %v172_v16, %v156_v11  ;;  %777 = vrot.lane.b32.xlu0 %v1211_v35, %s1087_s30  ;;  %779 = vrot.lane.b32.xlu1 %v1217_v37, %s1087_s30  ;;  %v244_v22 = vmul.f32 0.0010283801, %v242_v58 }
 0x1d7   :  { %v192_v31 = vadd.f32 %v190_v19, %v174_v28  ;;  %v434_v32 = vpop.permute.xlu0 %433  ;;  %v436_v34 = vpop.permute.xlu1 %435  ;;  %v1526_v25 = vmul.f32 %v380_v26, %v380_v26 }
 0x1d8   :  { %v437_v40 = vsel %vm99_vm2, %v434_v32, 0.0  ;;  %v438_v42 = vsel %vm99_vm2, %v436_v34, 0.0 }
 0x1d9   :  { %v210_v44 = vadd.f32 %v208_v21, %v192_v31  ;;  %v439_v46 = vadd.f32 %v437_v40, %v431_v36  ;;  %v440_v8 = vadd.f32 %v438_v42, %v432_v38  ;;  %827 = vrot.lane.b32.xlu0 %v1155_v9, %s1080_s23  ;;  %829 = vrot.lane.b32.xlu1 %v1157_v12, %s1080_s23 }
 0x1db   :  { %v228_v50 = vadd.f32 %v226_v43, %v210_v44  ;;  %v441_v51 = vmul.f32 0.21300554, %v439_v46  ;;  %v442_v52 = vmul.f32 0.21300554, %v440_v8  ;;  %v564_v53 = vpop.permute.xlu0 %563  ;;  %v566_v54 = vpop.permute.xlu1 %565 }
 0x1dc   :  { %v567_v27 = vsel %vm94_vm3, %v564_v53, 0.0  ;;  %v568_v29 = vsel %vm94_vm3, %v566_v54, 0.0 }
 0x1dd   :  { %v443_v24 = vadd.f32 %v441_v51, %v425_v47  ;;  %v444_v56 = vadd.f32 %v442_v52, %v426_v48  ;;  %v246_v57 = vadd.f32 %v244_v22, %v228_v50 }
 0x1df   :  { %v570_v59 = vpop.permute.xlu0 %569  ;;  %v572_v60 = vpop.permute.xlu1 %571  ;;  %v1528_v61 = vmul.f32 %v246_v57, %v246_v57  ;;  %v1530_v62 = vmul.f32 %v380_v26, %v246_v57 }
 0x1e0   :  { %v573_v58 = vsel %vm99_vm2, %v570_v59, 0.0  ;;  %v574_v23 = vsel %vm99_vm2, %v572_v60, 0.0 }
 0x1e1   :  { %v575_v63 = vadd.f32 %v573_v58, %v567_v27  ;;  %v576_v0 = vadd.f32 %v574_v23, %v568_v29  ;;  %v1542_v1 = vadd.f32 %v1526_v25, %v1528_v61 }
 0x1e3   :  { %v577_v3 = vmul.f32 0.21300554, %v575_v63  ;;  %v578_v55 = vmul.f32 0.21300554, %v576_v0  ;;  %v446_v5 = vpop.permute.xlu0 %445  ;;  %v448_v6 = vpop.permute.xlu1 %447 }
 0x1e4   :  { %v449_v15 = vsel %vm95_vm5, %v446_v5, 0.0  ;;  %v450_v16 = vsel %vm95_vm5, %v448_v6, 0.0 }
 0x1e5   :  { %v579_v7 = vadd.f32 %v577_v3, %v561_v2  ;;  %v580_v10 = vadd.f32 %v578_v55, %v562_v4 }
 0x1e7   :  { %v452_v45 = vpop.permute.xlu0 %451  ;;  %v454_v11 = vpop.permute.xlu1 %453 }
 0x1e8   :  { %v455_v17 = vsel %vm100_vm4, %v452_v45, 0.0  ;;  %v456_v30 = vsel %vm100_vm4, %v454_v11, 0.0 }
 0x1e9   :  { %v457_v33 = vadd.f32 %v455_v17, %v449_v15  ;;  %v458_v18 = vadd.f32 %v456_v30, %v450_v16 }
 0x1eb   :  { %v459_v19 = vmul.f32 0.10936069, %v457_v33  ;;  %v460_v26 = vmul.f32 0.10936069, %v458_v18  ;;  %v582_v28 = vpop.permute.xlu0 %581  ;;  %v584_v21 = vpop.permute.xlu1 %583 }
 0x1ec   :  { %v585_v38 = vsel %vm95_vm5, %v582_v28, 0.0  ;;  %v586_v40 = vsel %vm95_vm5, %v584_v21, 0.0 }
 0x1ed   :  { %v461_v31 = vadd.f32 %v459_v19, %v443_v24  ;;  %v462_v32 = vadd.f32 %v460_v26, %v444_v56 }
 0x1ef   :  { %v588_v34 = vpop.permute.xlu0 %587  ;;  %v590_v36 = vpop.permute.xlu1 %589 }
 0x1f0   :  { %v591_v42 = vsel %vm100_vm4, %v588_v34, 0.0  ;;  %v592_v43 = vsel %vm100_vm4, %v590_v36, 0.0 }
 0x1f1   :  { %v593_v44 = vadd.f32 %v591_v42, %v585_v38  ;;  %v594_v46 = vadd.f32 %v592_v43, %v586_v40 }
 0x1f3   :  { %v595_v8 = vmul.f32 0.10936069, %v593_v44  ;;  %v596_v47 = vmul.f32 0.10936069, %v594_v46  ;;  %v464_v48 = vpop.permute.xlu0 %463  ;;  %v466_v22 = vpop.permute.xlu1 %465 }
 0x1f4   :  { %v467_v54 = vsel %vm96_vm6, %v464_v48, 0.0  ;;  %v468_v24 = vsel %vm96_vm6, %v466_v22, 0.0 }
 0x1f5   :  { %v1562_v50 = vadd.f32 %v595_v8, %v579_v7  ;;  %v1564_v51 = vadd.f32 %v596_v47, %v580_v10 }
 0x1f7   :  { %v470_v52 = vpop.permute.xlu0 %469  ;;  %v472_v53 = vpop.permute.xlu1 %471 }
 0x1f8   :  { %v473_v56 = vsel %vm101_vm7, %v470_v52, 0.0  ;;  %v474_v57 = vsel %vm101_vm7, %v472_v53, 0.0 }
 0x1f9   :  { %v475_v59 = vadd.f32 %v473_v56, %v467_v54  ;;  %v476_v60 = vadd.f32 %v474_v57, %v468_v24 }
 0x1fb   :  { %v477_v27 = vmul.f32 0.036000773, %v475_v59  ;;  %v478_v29 = vmul.f32 0.036000773, %v476_v60  ;;  %v600_v58 = vpop.permute.xlu0 %599  ;;  %v602_v23 = vpop.permute.xlu1 %601 }
 0x1fc   :  { %v603_v34 = vsel %vm96_vm6, %v600_v58, 0.0  ;;  %v604_v36 = vsel %vm96_vm6, %v602_v23, 0.0 }
 0x1fd   :  { %v479_v63 = vadd.f32 %v477_v27, %v461_v31  ;;  %v480_v0 = vadd.f32 %v478_v29, %v462_v32 }
 0x1ff   :  { %v606_v2 = vpop.permute.xlu0 %605  ;;  %v608_v3 = vpop.permute.xlu1 %607 }
 0x200   :  { %v609_v28 = vsel %vm101_vm7, %v606_v2, 0.0  ;;  %v610_v21 = vsel %vm101_vm7, %v608_v3, 0.0 }
 0x201   :  { %v611_v48 = vadd.f32 %v609_v28, %v603_v34  ;;  %v612_v22 = vadd.f32 %v610_v21, %v604_v36 }
 0x203   :  { %v482_v4 = vpop.permute.xlu0 %481  ;;  %v484_v55 = vpop.permute.xlu1 %483  ;;  %v613_v2 = vmul.f32 0.036000773, %v611_v48  ;;  %v614_v3 = vmul.f32 0.036000773, %v612_v22 }
 0x204   :  { %v485_v17 = vsel %vm97_vm8, %v482_v4, 0.0  ;;  %v486_v30 = vsel %vm97_vm8, %v484_v55, 0.0 }
 0x207   :  { %v488_v5 = vpop.permute.xlu0 %487  ;;  %v490_v6 = vpop.permute.xlu1 %489 }
 0x208   :  { %v491_v45 = vsel %vm102_vm9, %v488_v5, 0.0  ;;  %v492_v11 = vsel %vm102_vm9, %v490_v6, 0.0 }
 0x209   :  { %v493_v33 = vadd.f32 %v491_v45, %v485_v17  ;;  %v494_v18 = vadd.f32 %v492_v11, %v486_v30  ;;  %v615_v17 = vadd.f32 %v613_v2, %v1562_v50 }
 0x20b   :  { %v618_v7 = vpop.permute.xlu0 %617  ;;  %v620_v10 = vpop.permute.xlu1 %619  ;;  %v495_v31 = vmul.f32 0.007598758, %v493_v33  ;;  %v496_v32 = vmul.f32 0.007598758, %v494_v18 }
 0x20c   :  { %v621_v56 = vsel %vm97_vm8, %v618_v7, 0.0  ;;  %v622_v57 = vsel %vm97_vm8, %v620_v10, 0.0 }
 0x20d   :  { %v497_v54 = vadd.f32 %v495_v31, %v479_v63  ;;  %v498_v24 = vadd.f32 %v496_v32, %v480_v0 }
 0x20f   :  { %v624_v15 = vpop.permute.xlu0 %623  ;;  %v626_v16 = vpop.permute.xlu1 %625 }
 0x210   :  { %v627_v38 = vsel %vm102_vm9, %v624_v15, 0.0  ;;  %v628_v40 = vsel %vm102_vm9, %v626_v16, 0.0 }
 0x211   :  { %v629_v59 = vadd.f32 %v627_v38, %v621_v56  ;;  %v630_v60 = vadd.f32 %v628_v40, %v622_v57 }
 0x213   :  { %v500_v19 = vpop.permute.xlu0 %499  ;;  %v502_v26 = vpop.permute.xlu1 %501  ;;  %v631_v5 = vmul.f32 0.007598758, %v629_v59  ;;  %v632_v6 = vmul.f32 0.007598758, %v630_v60 }
 0x214   :  { %v503_v44 = vsel %vm98_vm10, %v500_v19, 0.0  ;;  %v504_v46 = vsel %vm98_vm10, %v502_v26, 0.0 }
 0x215   :  { %v633_v33 = vadd.f32 %v631_v5, %v615_v17  ;;  %v697_v5 = vmul.f32 0.26601171, %v1211_v35 }
 0x217   :  { %v506_v42 = vpop.permute.xlu0 %505  ;;  %v508_v43 = vpop.permute.xlu1 %507 }
 0x218   :  { %v509_v8 = vsel %vm103_vm11, %v506_v42, 0.0  ;;  %v510_v47 = vsel %vm103_vm11, %v508_v43, 0.0  ;;  %v814_v43 = vadd.f32 0.0001, %v1542_v1 }
 0x219   :  { %v511_v52 = vadd.f32 %v509_v8, %v503_v44  ;;  %v512_v53 = vadd.f32 %v510_v47, %v504_v46 }
 0x21b   :  { %v513_v27 = vmul.f32 0.0010283801, %v511_v52  ;;  %v514_v29 = vmul.f32 0.0010283801, %v512_v53  ;;  %v636_v58 = vpop.permute.xlu0 %635  ;;  %v638_v23 = vpop.permute.xlu1 %637 }
 0x21c   :  { %v639_v10 = vsel %vm98_vm10, %v636_v58, 0.0  ;;  %v640_v11 = vsel %vm98_vm10, %v638_v23, 0.0 }
 0x21d   :  { %v515_v4 = vadd.f32 %v513_v27, %v497_v54  ;;  %v516_v55 = vadd.f32 %v514_v29, %v498_v24 }
 0x21f   :  { %v795_v63 = vsub.f32 %v515_v4, %v1495_v49  ;;  %v796_v0 = vsub.f32 %v516_v55, %v1528_v61  ;;  %v642_v7 = vpop.permute.xlu0 %641  ;;  %v644_v45 = vpop.permute.xlu1 %643  ;;  %v616_v49 = vadd.f32 %v614_v3, %v1564_v51  ;;  %v813_v51 = vadd.f32 0.0001, %v1504_v20 }
 0x220   :  { %v645_v15 = vsel %vm103_vm11, %v642_v7, 0.0  ;;  %v646_v16 = vsel %vm103_vm11, %v644_v45, 0.0 }
 0x221   :  { %v647_v30 = vadd.f32 %v645_v15, %v639_v10  ;;  %v648_v61 = vadd.f32 %v646_v16, %v640_v11  ;;  %v634_v18 = vadd.f32 %v632_v6, %v616_v49 }
 0x223   :  { %v649_v19 = vmul.f32 0.0010283801, %v647_v30  ;;  %v650_v26 = vmul.f32 0.0010283801, %v648_v61  ;;  %v700_v28 = vpop.permute.xlu0 %699  ;;  %v702_v21 = vpop.permute.xlu1 %701  ;;  %v698_v30 = vmul.f32 0.26601171, %v1217_v37 }
 0x224   :  { %v703_v59 = vsel %vm94_vm3, %v700_v28, 0.0  ;;  %v704_v60 = vsel %vm94_vm3, %v702_v21, 0.0  ;;  %v837_v37 = vrot.slane %v1155_v9, 1 }
 0x225   :  { %v651_v31 = vadd.f32 %v649_v19, %v633_v33  ;;  %v652_v32 = vadd.f32 %v650_v26, %v634_v18  ;;  %v80_v18 = vshrl.u32 %v77_v39, 7 }
 0x227   :  { %v797_v34 = vsub.f32 %v651_v31, %v1498_v13  ;;  %v798_v36 = vsub.f32 %v652_v32, %v1526_v25  ;;  %v706_v38 = vpop.permute.xlu0 %705  ;;  %v708_v40 = vpop.permute.xlu1 %707  ;;  %vm839_vm12 = vcmp.lt.s32.totalorder %v80_v18, 7 }
 0x228   :  { %v709_v56 = vsel %vm99_vm2, %v706_v38, 0.0  ;;  %v710_v20 = vsel %vm99_vm2, %v708_v40, 0.0 }
 0x229   :  { %v815_v42 = vadd.f32 %v797_v34, %v795_v63  ;;  %v816_v50 = vadd.f32 %v798_v36, %v796_v0  ;;  %v711_v58 = vadd.f32 %v709_v56, %v703_v59  ;;  %v712_v23 = vadd.f32 %v710_v20, %v704_v60 }
 0x22a   :  { %v81_v56 = vadd.s32 8, %v80_v18 }
 0x22b   :  { %v817_v44 = vadd.f32 0.0009, %v815_v42  ;;  %v818_v46 = vadd.f32 0.0009, %v816_v50  ;;  %v718_v8 = vpop.permute.xlu0 %717  ;;  %v720_v47 = vpop.permute.xlu1 %719  ;;  %v713_v16 = vmul.f32 0.21300554, %v711_v58 }
 0x22c   :  { %v721_v2 = vsel %vm95_vm5, %v718_v8, 0.0  ;;  %v722_v3 = vsel %vm95_vm5, %v720_v47, 0.0  ;;  %v714_v17 = vmul.f32 0.21300554, %v712_v23  ;;  %v838_v42 = vrot.slane %v1157_v12, 1 }
 0x22d   :  { %v1622_v48 = vmul.f32 %v817_v44, %v813_v51  ;;  %v1624_v22 = vmul.f32 %v818_v46, %v814_v43  ;;  %v715_v34 = vadd.f32 %v713_v16, %v697_v5  ;;  %vm836_vm13 = vcmp.lt.s32.totalorder %v81_v56, 15 }
 0x22e   :  { %v716_v36 = vadd.f32 %v714_v17, %v698_v30  ;;  %v841_v20 = vsel %vm839_vm12, %v838_v42, %v837_v37 }
 0x22f   :  { %v724_v52 = vpop.permute.xlu0 %723  ;;  %v726_v13 = vpop.permute.xlu1 %725  ;;  %972 = vrcp.f32 %v1622_v48 }
 0x230   :  { %v727_v27 = vsel %vm100_vm4, %v724_v52, 0.0  ;;  %v728_v29 = vsel %vm100_vm4, %v726_v13, 0.0  ;;  %974 = vrcp.f32 %v1624_v22 }
 0x231   :  { %v729_v6 = vadd.f32 %v727_v27, %v721_v2  ;;  %v730_v63 = vadd.f32 %v728_v29, %v722_v3  ;;  %v801_v2 = vmul.f32 2.0, %v1500_v14  ;;  %v840_v3 = vsel %vm839_vm12, %v837_v37, %v838_v42 }
 0x233   :  { %v736_v53 = vpop.permute.xlu0 %735  ;;  %v738_v25 = vpop.permute.xlu1 %737  ;;  %v731_v19 = vmul.f32 0.10936069, %v729_v6  ;;  %v732_v26 = vmul.f32 0.10936069, %v730_v63 }
 0x234   :  { %v739_v45 = vsel %vm96_vm6, %v736_v53, 0.0  ;;  %v740_v10 = vsel %vm96_vm6, %v738_v25, 0.0 }
 0x235   :  { %v733_v50 = vadd.f32 %v731_v19, %v715_v34  ;;  %v734_v51 = vadd.f32 %v732_v26, %v716_v36 }
 0x237   :  { %v742_v54 = vpop.permute.xlu0 %741  ;;  %v744_v24 = vpop.permute.xlu1 %743 }
 0x238   :  { %v745_v4 = vsel %vm101_vm7, %v742_v54, 0.0  ;;  %v746_v55 = vsel %vm101_vm7, %v744_v24, 0.0 }
 0x239   :  { %v747_v49 = vadd.f32 %v745_v4, %v739_v45  ;;  %v748_v35 = vadd.f32 %v746_v55, %v740_v10  ;;  %v843_v4 = vsub.f32 %v841_v20, %v1157_v12  ;;  %v802_v55 = vmul.f32 2.0, %v1530_v62  ;;  %v973_v17 = vpop.eup %972 }
 0x23a   :  { %v803_v45 = vadd.f32 0.0001, %v801_v2  ;;  %v848_v10 = vmul.f32 %v1155_v9, %v1155_v9  ;;  %v975_v19 = vpop.eup %974 }
 0x23b   :  { %v754_v1 = vpop.permute.xlu0 %753  ;;  %v756_v57 = vpop.permute.xlu1 %755  ;;  %v749_v38 = vmul.f32 0.036000773, %v747_v49  ;;  %v750_v40 = vmul.f32 0.036000773, %v748_v35  ;;  %v804_v16 = vadd.f32 0.0001, %v802_v55 }
 0x23c   :  { %v757_v61 = vsel %vm97_vm8, %v754_v1, 0.0  ;;  %v758_v33 = vsel %vm97_vm8, %v756_v57, 0.0 }
 0x23d   :  { %v751_v53 = vadd.f32 %v749_v38, %v733_v50  ;;  %v752_v25 = vadd.f32 %v750_v40, %v734_v51 }
 0x23f   :  { %v760_v0 = vpop.permute.xlu0 %759  ;;  %v762_v7 = vpop.permute.xlu1 %761 }
 0x240   :  { %v763_v11 = vsel %vm102_vm9, %v760_v0, 0.0  ;;  %v764_v15 = vsel %vm102_vm9, %v762_v7, 0.0  ;;  %v842_v7 = vsub.f32 %v840_v3, %v1155_v9 }
 0x241   :  { %v765_v28 = vadd.f32 %v763_v11, %v757_v61  ;;  %v766_v21 = vadd.f32 %v764_v15, %v758_v33  ;;  %v845_v11 = vsel %vm836_vm13, %v843_v4, 0.0 }
 0x242   :  { %v856_v33 = vmul.f32 %v842_v7, %v842_v7  ;;  %v857_v18 = vmul.f32 %v845_v11, %v845_v11 }
 0x243   :  { %v772_v31 = vpop.permute.xlu0 %771  ;;  %v774_v32 = vpop.permute.xlu1 %773  ;;  %v767_v43 = vmul.f32 0.007598758, %v765_v28  ;;  %v768_v44 = vmul.f32 0.007598758, %v766_v21 }
 0x244   :  { %v775_v8 = vsel %vm98_vm10, %v772_v31, 0.0  ;;  %v776_v47 = vsel %vm98_vm10, %v774_v32, 0.0  ;;  %v858_v34 = vmul.f32 5.2083335e-05, %v856_v33  ;;  %v859_v38 = vmul.f32 5.2083335e-05, %v857_v18 }
 0x245   :  { %v769_v1 = vadd.f32 %v767_v43, %v751_v53  ;;  %v770_v57 = vadd.f32 %v768_v44, %v752_v25 }
 0x247   :  { %v778_v39 = vpop.permute.xlu0 %777  ;;  %v780_v46 = vpop.permute.xlu1 %779 }
 0x248   :  { %v781_v52 = vsel %vm103_vm11, %v778_v39, 0.0  ;;  %v782_v13 = vsel %vm103_vm11, %v780_v46, 0.0 }
 0x249   :  { %v783_v54 = vadd.f32 %v781_v52, %v775_v8  ;;  %v784_v24 = vadd.f32 %v782_v13, %v776_v47 }
 0x24b   :  { %v785_v59 = vmul.f32 0.0010283801, %v783_v54  ;;  %v786_v60 = vmul.f32 0.0010283801, %v784_v24  ;;  %v828_v58 = vpop.permute.xlu0 %827  ;;  %v830_v23 = vpop.permute.xlu1 %829 }
 0x24c   :  { %v831_v6 = vsub.f32 %v828_v58, %v1155_v9  ;;  %v832_v22 = vsub.f32 %v830_v23, %v1157_v12  ;;  %v850_v9 = vmul.f32 0.00048828125, %v848_v10 }
 0x24d   :  { %v787_v27 = vadd.f32 %v785_v59, %v769_v1  ;;  %v788_v29 = vadd.f32 %v786_v60, %v770_v57 }
 0x24e   :  { %v833_v49 = vsel %vm94_vm3, %v831_v6, 0.0  ;;  %v834_v35 = vsel %vm94_vm3, %v832_v22, 0.0 }
 0x24f   :  { %v799_v48 = vsub.f32 %v787_v27, %v1500_v14  ;;  %v800_v5 = vsub.f32 %v788_v29, %v1530_v62  ;;  %v849_v14 = vmul.f32 %v1157_v12, %v1157_v12  ;;  %v862_v28 = vmul.f32 %v833_v49, %v833_v49 }
 0x250   :  { %v863_v21 = vmul.f32 %v834_v35, %v834_v35 }
 0x251   :  { %v805_v63 = vmul.f32 2.0, %v799_v48  ;;  %v806_v0 = vmul.f32 2.0, %v800_v5  ;;  %v851_v26 = vmul.f32 0.00048828125, %v849_v14  ;;  %v864_v40 = vmul.f32 5.2083335e-05, %v862_v28 }
 0x252   :  { %v865_v37 = vmul.f32 5.2083335e-05, %v863_v21 }
 0x253   :  { %v807_v15 = vadd.f32 0.0009, %v805_v63  ;;  %v808_v62 = vadd.f32 0.0009, %v806_v0 }
 0x255   :  { %v809_v30 = vmul.f32 %v807_v15, %v803_v45  ;;  %v810_v61 = vmul.f32 %v808_v62, %v804_v16 }
 0x257   :  { %v823_v12 = vmul.f32 %v973_v17, %v809_v30  ;;  %v824_v31 = vmul.f32 %v975_v19, %v810_v61 }
 0x259   :  { %v852_v32 = vmul.f32 0.00048828125, %v823_v12  ;;  %v853_v36 = vmul.f32 0.00048828125, %v824_v31 }
 0x25b   :  { %v854_v42 = vsub.f32 %v850_v9, %v852_v32  ;;  %v855_v41 = vsub.f32 %v851_v26, %v853_v36 }
 0x25d   :  { %v860_v50 = vadd.f32 %v858_v34, %v854_v42  ;;  %v861_v51 = vadd.f32 %v859_v38, %v855_v41 }
 0x25f   :  { %v866_v43 = vadd.f32 %v864_v40, %v860_v50  ;;  %v867_v44 = vadd.f32 %v865_v37, %v861_v51 }
 0x261   :  { %877 = vadd.xlane.f32.xlu0 %v866_v43  ;;  %879 = vadd.xlane.f32.xlu1 %v867_v44 }
 0x2ee   :  { %v878_v39 = vpop.xlane.xlu0 %877  ;;  %v880_v46 = vpop.xlane.xlu1 %879 }
 0x2ef   :  { %v881_v8 = vadd.f32 %v880_v46, %v878_v39 }
 0x2f1   :  { %v882_v47 = vrot.slane %v881_v8, 4 }
 0x2f3   :  { %v883_v52 = vadd.f32 %v882_v47, %v881_v8 }
 0x2f5   :  { %v884_v13 = vrot.slane %v883_v52, 2 }
 0x2f7   :  { %v885_v53 = vadd.f32 %v884_v13, %v883_v52 }
 0x2f9   :  { %v886_v25 = vrot.slane %v885_v53, 1 }
 0x2fb   :  { %v887_v54 = vadd.f32 %v886_v25, %v885_v53 }
 0x2fd   :  { %889 = vst.msk [vmem:[#allocation9] sm:$0x1] %vm888_vm14, %v887_v54 }
 0x2fe   :  { %1053 = shalt.err (!%p1050_p0)
}
 0x2ff   :  { %s1054_s9 = scalar_lea.hbm %s1706_s3, 16 }
 0x300   :  { %p1055_p1 = scmp.ne.s32.totalorder %s1706_s3, %s1054_s9  ;;  %p1058_p2 = scmp.lt.u32.totalorder %s1054_s9, %s1706_s3 }
 0x302   :  { %p1060_p3 = pnand %p1058_p2, %p1055_p1 }
 0x304   :  { %1063 = shalt.err (!%p1060_p3)
}
 0x305   :  { %899 = dma.vmem_to_hbm [thread:$0]  %s897_s5, 16, %s1706_s3, [#allocation5]  }
 0x306   :  { %1068 = dma.done.wait [#allocation5], 16  }
 0x307   :  { %1069 = vsyncadd [#allocation5], 4294967280 }
 0x308   :  { %903 = vsyncpa [#allocation4], 1 }
 0x309   :  { %904 = vsyncpa [#allocation7], 1 }
 0x30a   :  { %905 = vsyncpa [#allocation5], 1 }

</bundles_post_ra>
